<compile_context>
chip_gen: v7x
topology: tpu7x:2x2x1
jax: 0.10.0
libtpu: 0.0.40
codegen_flags: <defaults>
</compile_context>

<pallas_src>
import jax
import jax.numpy as jnp
import numpy as np
from jax import lax
from jax.experimental import pallas as pl
from jax.experimental.pallas import tpu as pltpu


def _permute_gates_ifog(w):
    """Reorder 4H gate columns from PyTorch order (i,f,g,o) to (i,f,o,g)."""
    i, f, g, o = jnp.split(w, 4, axis=-1)
    return jnp.concatenate([i, f, o, g], axis=-1)


# ----------------------------- Wrapper + kernel ------------------------------

def lstm_seq2seq_forward(x, params, output_time_step):
    """x: [B, T_in, D_in] float32.  Returns (pred_last, pred_last, outputs)."""
    f32 = jnp.float32
    B, Tin, Din = x.shape
    Tout = int(output_time_step)
    p = params
    EMB = p["we_e"].shape[0]
    H = p["whh_e"].shape[1]
    H4 = 4 * H
    assert p["wfc"].shape[0] == 1, "decoder feeds its prediction back -> output_dim must be 1"
    # TODO(synk): num_layer > 1 stacked LSTM not implemented (single layer used).

    # ---- input: time-major, flattened, + ones column (folds encoder emb bias)
    xf = jnp.transpose(x, (1, 0, 2)).reshape(Tin * B, Din).astype(f32)
    xf1 = jnp.concatenate([xf, jnp.ones((Tin * B, 1), f32)], axis=-1)   # [Tin*B, Din+1]

    # ---- weights: pre-transpose to [in, out], permute gates to (i,f,o,g),
    #      pre-sum the two LSTM gate biases, fold the encoder embedding bias,
    #      then pack EVERYTHING into a single lane-H4 (=128) slab.
    wih_e = _permute_gates_ifog(p["wih_e"].T.astype(f32))               # [EMB, 4H]
    whh_e = _permute_gates_ifog(p["whh_e"].T.astype(f32))               # [H,   4H]
    wih_d = _permute_gates_ifog(p["wih_d"].T.astype(f32))               # [EMB, 4H]
    whh_d = _permute_gates_ifog(p["whh_d"].T.astype(f32))               # [H,   4H]
    bg_e = _permute_gates_ifog((p["bih_e"] + p["bhh_e"]).astype(f32))   # [1, 4H]
    bg_d = _permute_gates_ifog((p["bih_d"] + p["bhh_d"]).astype(f32))   # [1, 4H]
    we_e1 = jnp.concatenate([p["we_e"].T.astype(f32),
                             p["be_e"].astype(f32)], axis=0)            # [Din+1, EMB]
    we_d = p["we_d"].T.astype(f32)                                      # [1, EMB]
    be_d = p["be_d"].astype(f32)                                        # [1, EMB]
    wfc = p["wfc"].astype(f32)                                          # [1, H]
    bfc = p["bfc"].astype(f32)                                          # [1, 1]

    LANES = H4
    assert LANES >= EMB and LANES >= H

    rows = []
    offs = {}

    def add(name, a, align=1):
        r0 = sum(r.shape[0] for r in rows)
        pad = (-r0) % align
        if pad:
            rows.append(jnp.zeros((pad, LANES), f32))
            r0 += pad
        offs[name] = r0
        rows.append(jnp.pad(a, ((0, 0), (0, LANES - a.shape[-1]))))

    add("wih_e", wih_e, align=8)     # used every encoder step's gate pre-projection
    add("whh_e", whh_e, align=8)     # used every encoder step (recurrent matmul)
    add("wih_d", wih_d, align=8)     # used every decoder step
    add("whh_d", whh_d, align=8)     # used once (hoisted decoder recurrence)
    add("bg_e", bg_e)
    add("bg_d", bg_d)
    add("we_d", we_d)
    add("be_d", be_d)
    add("wfc", wfc)
    add("bfc", bfc)
    add("we_e1", we_e1)
    slab = jnp.concatenate(rows, axis=0)
    row_pad = (-slab.shape[0]) % 8
    if row_pad:
        slab = jnp.pad(slab, ((0, row_pad), (0, 0)))

    # ------------------------------- kernel ----------------------------------
    def kernel(x_ref, w_ref, out_ref):
        TinB = Tin * B

        def gate_update(gates, c):
            # gates columns are (i, f, o, g): one sigmoid over [:, :3H], one tanh.
            sg = jax.nn.sigmoid(gates[:, :3 * H])
            g = jnp.tanh(gates[:, 3 * H:])
            i_g = sg[:, :H]
            f_g = sg[:, H:2 * H]
            o_g = sg[:, 2 * H:3 * H]
            c_new = f_g * c + i_g * g
            h_new = o_g * jnp.tanh(c_new)
            return h_new, c_new

        # Static slices of the packed weight slab (8-aligned rows for the
        # matrices used inside the unrolled loops; tiny rows read once).
        wih_e_v = w_ref[offs["wih_e"]:offs["wih_e"] + EMB, :]
        whh_e_v = w_ref[offs["whh_e"]:offs["whh_e"] + H, :]
        wih_d_v = w_ref[offs["wih_d"]:offs["wih_d"] + EMB, :]
        whh_d_v = w_ref[offs["whh_d"]:offs["whh_d"] + H, :]
        bg_e_v = w_ref[offs["bg_e"]:offs["bg_e"] + 1, :]
        bg_d_v = w_ref[offs["bg_d"]:offs["bg_d"] + 1, :]
        we_d_row = w_ref[offs["we_d"]:offs["we_d"] + 1, :EMB]
        be_d_row = w_ref[offs["be_d"]:offs["be_d"] + 1, :EMB]
        wfc_row = w_ref[offs["wfc"]:offs["wfc"] + 1, :H]
        bfc_v = w_ref[offs["bfc"]:offs["bfc"] + 1, :1]
        we_e1_v = w_ref[offs["we_e1"]:offs["we_e1"] + Din + 1, :EMB]

        # ---------------- Encoder --------------------------------------------
        # Batched-over-time input projections: relu([X,1] @ [We;be]) and its
        # gate projection are computed once for all T_in steps and kept in
        # registers (Tin*B x 4H is only 2 vregs at these shapes).
        xf_v = x_ref[...]                                              # [Tin*B, Din+1]
        e_all = jnp.maximum(
            jnp.dot(xf_v, we_e1_v, preferred_element_type=jnp.float32), 0.0)
        gx = (jnp.dot(e_all, wih_e_v, preferred_element_type=jnp.float32)
              + bg_e_v)                                                # [Tin*B, 4H]

        h = jnp.zeros((B, H), jnp.float32)
        c = jnp.zeros((B, H), jnp.float32)
        # TODO(synk): cap the unroll if Tin is ever configured large.
        for t in range(Tin):                       # static unroll, static slices
            gates = (gx[t * B:(t + 1) * B, :]
                     + jnp.dot(h, whh_e_v, preferred_element_type=jnp.float32))
            h, c = gate_update(gates, c)
        # h, c == encoder (hidden, cell)

        # ---------------- Decoder --------------------------------------------
        # PyTorch Decoder returns the SAME (hidden, cell) it was given, so each
        # step restarts its 1-step LSTM from the encoder state -> the recurrent
        # projection is loop-invariant and hoisted.
        gh_d = (jnp.dot(h, whh_d_v, preferred_element_type=jnp.float32)
                + bg_d_v)                                              # [B, 4H]
        dec_in = xf_v[TinB - B:TinB, Din - 1:Din]                      # [B, 1] = x[:, -1, -1:]
        lane_idx = lax.broadcasted_iota(jnp.int32, (B, Tout), 1)
        outs = jnp.zeros((B, Tout), jnp.float32)
        for i in range(Tout):                                          # static unroll
            # K=1 "matmul" -> VPU broadcast multiply.
            e = jnp.maximum(dec_in * we_d_row + be_d_row, 0.0)         # [B, EMB]
            gates = gh_d + jnp.dot(e, wih_d_v,
                                   preferred_element_type=jnp.float32) # [B, 4H]
            h_d, _ = gate_update(gates, c)                             # c == c_enc (see note)
            # N=1 "matmul" -> VPU multiply + lane reduce.
            pred = jnp.sum(h_d * wfc_row, axis=-1, keepdims=True) + bfc_v  # [B, 1]
            outs = jnp.where(lane_idx == i, pred, outs)                # compile-time mask
            dec_in = pred
        out_ref[...] = outs                                            # single store

    vmem = pl.BlockSpec(memory_space=pltpu.MemorySpace.VMEM)
    outs2d = pl.pallas_call(
        kernel,
        out_shape=jax.ShapeDtypeStruct((B, Tout), jnp.float32),
        in_specs=[vmem, vmem],
        out_specs=vmem,
        # TODO(synk): for large-batch throughput on v7x, add a parallel grid
        # axis over batch tiles + dimension_semantics=("parallel",).
    )(xf1, slab)

    outputs = outs2d[:, :, None]          # [B, T_out, 1]
    last = outs2d[:, -1:]                 # [B, 1]  (criterion=None -> returned twice)
    return last, last, outputs


# ----------------------------- Pure-JAX reference ---------------------------

def reference_forward(x, p, output_time_step):
    B, Tin, Din = x.shape
    H = p["whh_e"].shape[1]

    def cell(xt, h, c, wih, whh, bih, bhh):
        g = xt @ wih.T + bih + h @ whh.T + bhh
        i = jax.nn.sigmoid(g[:, :H])
        f = jax.nn.sigmoid(g[:, H:2 * H])
        gg = jnp.tanh(g[:, 2 * H:3 * H])
        o = jax.nn.sigmoid(g[:, 3 * H:])
        c = f * c + i * gg
        h = o * jnp.tanh(c)
        return h, c

    h = jnp.zeros((B, H), jnp.float32)
    c = jnp.zeros((B, H), jnp.float32)
    for t in range(Tin):
        e = jax.nn.relu(x[:, t] @ p["we_e"].T + p["be_e"])
        h, c = cell(e, h, c, p["wih_e"], p["whh_e"], p["bih_e"], p["bhh_e"])

    dec_in = x[:, -1, -1:]                                            # [B, 1]
    outs = []
    for _ in range(output_time_step):
        e = jax.nn.relu(dec_in @ p["we_d"].T + p["be_d"])
        h_d, _ = cell(e, h, c, p["wih_d"], p["whh_d"], p["bih_d"], p["bhh_d"])
        pred = h_d @ p["wfc"].T + p["bfc"]
        outs.append(pred)
        dec_in = pred
    outputs = jnp.stack(outs, axis=1)                                 # [B, T_out, 1]
    return outputs[:, -1], outputs


# ----------------------------- Main ------------------------------------------

if __name__ == "__main__":
    # Config implied by the module: output_dim must be 1 (decoder feeds its own
    # prediction into Linear(in_features=1)); num_layer=1 -> dropout=0.
    B = 2
    T_IN = 8          # input_time_step
    T_OUT = 4         # output_time_step
    D_IN = 4          # input_dim
    OUT_DIM = 1       # output_dim
    EMB = 16          # embedding_size
    HID = 32          # hidden_size

    key = jax.random.PRNGKey(0)
    keys = jax.random.split(key, 16)

    def init(k, shape, scale=0.1):
        return scale * jax.random.normal(k, shape, dtype=jnp.float32)

    params = {
        # Encoder
        "we_e":  init(keys[0], (EMB, D_IN)),
        "be_e":  init(keys[1], (1, EMB)),
        "wih_e": init(keys[2], (4 * HID, EMB)),
        "whh_e": init(keys[3], (4 * HID, HID)),
        "bih_e": init(keys[4], (1, 4 * HID)),
        "bhh_e": init(keys[5], (1, 4 * HID)),
        # Decoder
        "we_d":  init(keys[6], (EMB, 1)),
        "be_d":  init(keys[7], (1, EMB)),
        "wih_d": init(keys[8], (4 * HID, EMB)),
        "whh_d": init(keys[9], (4 * HID, HID)),
        "bih_d": init(keys[10], (1, 4 * HID)),
        "bhh_d": init(keys[11], (1, 4 * HID)),
        "wfc":   init(keys[12], (OUT_DIM, HID)),
        "bfc":   init(keys[13], (1, OUT_DIM)),
    }

    x = jax.random.normal(keys[14], (B, T_IN, D_IN), dtype=jnp.float32)
    y = jax.random.normal(keys[15], (B, T_OUT, OUT_DIM), dtype=jnp.float32)  # unused (criterion=None)

    pred_last, pred_last2, outputs = lstm_seq2seq_forward(x, params, T_OUT)
    jax.block_until_ready((pred_last, pred_last2, outputs))

    ref_last, ref_outputs = reference_forward(x, params, T_OUT)

    np.testing.assert_allclose(np.asarray(outputs), np.asarray(ref_outputs),
                               rtol=1e-3, atol=1e-4)
    np.testing.assert_allclose(np.asarray(pred_last), np.asarray(ref_last),
                               rtol=1e-3, atol=1e-4)

    print("KERNEL_OK")
</pallas_src>

<mosaic_0001>
module attributes {stable_mosaic.version = 11 : i64} {
  func.func @kernel(%arg0: memref<16x5xf32, #tpu.memory_space<vmem>>, %arg1: memref<112x128xf32, #tpu.memory_space<vmem>>, %arg2: memref<2x4xf32, #tpu.memory_space<vmem>>) attributes {dimension_semantics = [], scalar_prefetch = 0 : i64, scratch_operands = 0 : i64, tpu.core_type = #tpu.core_type<tc>} {
    %c0 = arith.constant 0 : index
    %c0_0 = arith.constant 0 : index
    %0 = vector.load %arg1[%c0, %c0_0] : memref<112x128xf32, #tpu.memory_space<vmem>>, vector<16x128xf32>
    %c16 = arith.constant 16 : index
    %c0_1 = arith.constant 0 : index
    %1 = vector.load %arg1[%c16, %c0_1] : memref<112x128xf32, #tpu.memory_space<vmem>>, vector<32x128xf32>
    %c48 = arith.constant 48 : index
    %c0_2 = arith.constant 0 : index
    %2 = vector.load %arg1[%c48, %c0_2] : memref<112x128xf32, #tpu.memory_space<vmem>>, vector<16x128xf32>
    %c64 = arith.constant 64 : index
    %c0_3 = arith.constant 0 : index
    %3 = vector.load %arg1[%c64, %c0_3] : memref<112x128xf32, #tpu.memory_space<vmem>>, vector<32x128xf32>
    %c96 = arith.constant 96 : index
    %c0_4 = arith.constant 0 : index
    %4 = vector.load %arg1[%c96, %c0_4] : memref<112x128xf32, #tpu.memory_space<vmem>>, vector<1x128xf32>
    %c97 = arith.constant 97 : index
    %c0_5 = arith.constant 0 : index
    %5 = vector.load %arg1[%c97, %c0_5] : memref<112x128xf32, #tpu.memory_space<vmem>>, vector<1x128xf32>
    %c98 = arith.constant 98 : index
    %c0_6 = arith.constant 0 : index
    %6 = vector.load %arg1[%c98, %c0_6] : memref<112x128xf32, #tpu.memory_space<vmem>>, vector<1x16xf32>
    %c99 = arith.constant 99 : index
    %c0_7 = arith.constant 0 : index
    %7 = vector.load %arg1[%c99, %c0_7] : memref<112x128xf32, #tpu.memory_space<vmem>>, vector<1x16xf32>
    %c100 = arith.constant 100 : index
    %c0_8 = arith.constant 0 : index
    %8 = vector.load %arg1[%c100, %c0_8] : memref<112x128xf32, #tpu.memory_space<vmem>>, vector<1x32xf32>
    %c101 = arith.constant 101 : index
    %c0_9 = arith.constant 0 : index
    %9 = vector.load %arg1[%c101, %c0_9] : memref<112x128xf32, #tpu.memory_space<vmem>>, vector<1x1xf32>
    %c102 = arith.constant 102 : index
    %c0_10 = arith.constant 0 : index
    %10 = vector.load %arg1[%c102, %c0_10] : memref<112x128xf32, #tpu.memory_space<vmem>>, vector<5x16xf32>
    %c0_11 = arith.constant 0 : index
    %c0_12 = arith.constant 0 : index
    %11 = vector.load %arg0[%c0_11, %c0_12] : memref<16x5xf32, #tpu.memory_space<vmem>>, vector<16x5xf32>
    %cst = arith.constant dense<0.000000e+00> : vector<16x16xf32>
    %12 = tpu.matmul %11, %10, %cst {dimension_numbers = #tpu.dot_dimension_numbers<[1], [0], [0], [1], [0, 0, 1, 1], [], []>} : vector<16x5xf32>, vector<5x16xf32>, vector<16x16xf32> -> vector<16x16xf32>
    %cst_13 = arith.constant 0.000000e+00 : f32
    %13 = vector.broadcast %cst_13 : f32 to vector<16x16xf32>
    %14 = arith.maximumf %12, %13 : vector<16x16xf32>
    %cst_14 = arith.constant dense<0.000000e+00> : vector<16x128xf32>
    %15 = tpu.matmul %14, %0, %cst_14 {dimension_numbers = #tpu.dot_dimension_numbers<[1], [0], [0], [1], [0, 0, 1, 1], [], []>} : vector<16x16xf32>, vector<16x128xf32>, vector<16x128xf32> -> vector<16x128xf32>
    %16 = vector.broadcast %4 : vector<1x128xf32> to vector<16x128xf32>
    %17 = arith.addf %15, %16 : vector<16x128xf32>
    %cst_15 = arith.constant 0.000000e+00 : f32
    %18 = vector.broadcast %cst_15 : f32 to vector<2x32xf32>
    %cst_16 = arith.constant 0.000000e+00 : f32
    %19 = vector.broadcast %cst_16 : f32 to vector<2x32xf32>
    %20 = vector.extract_strided_slice %17 {offsets = [0, 0], sizes = [2, 128], strides = [1, 1]} : vector<16x128xf32> to vector<2x128xf32>
    %cst_17 = arith.constant dense<0.000000e+00> : vector<2x128xf32>
    %21 = tpu.matmul %18, %1, %cst_17 {dimension_numbers = #tpu.dot_dimension_numbers<[1], [0], [0], [1], [0, 0, 1, 1], [], []>} : vector<2x32xf32>, vector<32x128xf32>, vector<2x128xf32> -> vector<2x128xf32>
    %22 = arith.addf %20, %21 : vector<2x128xf32>
    %23 = vector.extract_strided_slice %22 {offsets = [0, 0], sizes = [2, 96], strides = [1, 1]} : vector<2x128xf32> to vector<2x96xf32>
    %24 = arith.negf %23 : vector<2x96xf32>
    %25 = math.exp %24 : vector<2x96xf32>
    %cst_18 = arith.constant 1.000000e+00 : f32
    %26 = vector.broadcast %cst_18 : f32 to vector<2x96xf32>
    %27 = arith.addf %26, %25 : vector<2x96xf32>
    %28 = arith.divf %26, %27 : vector<2x96xf32>
    %29 = vector.extract_strided_slice %22 {offsets = [0, 96], sizes = [2, 32], strides = [1, 1]} : vector<2x128xf32> to vector<2x32xf32>
    %30 = math.tanh %29 : vector<2x32xf32>
    %31 = vector.extract_strided_slice %28 {offsets = [0, 0], sizes = [2, 32], strides = [1, 1]} : vector<2x96xf32> to vector<2x32xf32>
    %32 = vector.extract_strided_slice %28 {offsets = [0, 32], sizes = [2, 32], strides = [1, 1]} : vector<2x96xf32> to vector<2x32xf32>
    %33 = vector.extract_strided_slice %28 {offsets = [0, 64], sizes = [2, 32], strides = [1, 1]} : vector<2x96xf32> to vector<2x32xf32>
    %34 = arith.mulf %32, %19 : vector<2x32xf32>
    %35 = arith.mulf %31, %30 : vector<2x32xf32>
    %36 = arith.addf %34, %35 : vector<2x32xf32>
    %37 = math.tanh %36 : vector<2x32xf32>
    %38 = arith.mulf %33, %37 : vector<2x32xf32>
    %39 = vector.extract_strided_slice %17 {offsets = [2, 0], sizes = [2, 128], strides = [1, 1]} : vector<16x128xf32> to vector<2x128xf32>
    %cst_19 = arith.constant dense<0.000000e+00> : vector<2x128xf32>
    %40 = tpu.matmul %38, %1, %cst_19 {dimension_numbers = #tpu.dot_dimension_numbers<[1], [0], [0], [1], [0, 0, 1, 1], [], []>} : vector<2x32xf32>, vector<32x128xf32>, vector<2x128xf32> -> vector<2x128xf32>
    %41 = arith.addf %39, %40 : vector<2x128xf32>
    %42 = vector.extract_strided_slice %41 {offsets = [0, 0], sizes = [2, 96], strides = [1, 1]} : vector<2x128xf32> to vector<2x96xf32>
    %43 = arith.negf %42 : vector<2x96xf32>
    %44 = math.exp %43 : vector<2x96xf32>
    %cst_20 = arith.constant 1.000000e+00 : f32
    %45 = vector.broadcast %cst_20 : f32 to vector<2x96xf32>
    %46 = arith.addf %45, %44 : vector<2x96xf32>
    %47 = arith.divf %45, %46 : vector<2x96xf32>
    %48 = vector.extract_strided_slice %41 {offsets = [0, 96], sizes = [2, 32], strides = [1, 1]} : vector<2x128xf32> to vector<2x32xf32>
    %49 = math.tanh %48 : vector<2x32xf32>
    %50 = vector.extract_strided_slice %47 {offsets = [0, 0], sizes = [2, 32], strides = [1, 1]} : vector<2x96xf32> to vector<2x32xf32>
    %51 = vector.extract_strided_slice %47 {offsets = [0, 32], sizes = [2, 32], strides = [1, 1]} : vector<2x96xf32> to vector<2x32xf32>
    %52 = vector.extract_strided_slice %47 {offsets = [0, 64], sizes = [2, 32], strides = [1, 1]} : vector<2x96xf32> to vector<2x32xf32>
    %53 = arith.mulf %51, %36 : vector<2x32xf32>
    %54 = arith.mulf %50, %49 : vector<2x32xf32>
    %55 = arith.addf %53, %54 : vector<2x32xf32>
    %56 = math.tanh %55 : vector<2x32xf32>
    %57 = arith.mulf %52, %56 : vector<2x32xf32>
    %58 = vector.extract_strided_slice %17 {offsets = [4, 0], sizes = [2, 128], strides = [1, 1]} : vector<16x128xf32> to vector<2x128xf32>
    %cst_21 = arith.constant dense<0.000000e+00> : vector<2x128xf32>
    %59 = tpu.matmul %57, %1, %cst_21 {dimension_numbers = #tpu.dot_dimension_numbers<[1], [0], [0], [1], [0, 0, 1, 1], [], []>} : vector<2x32xf32>, vector<32x128xf32>, vector<2x128xf32> -> vector<2x128xf32>
    %60 = arith.addf %58, %59 : vector<2x128xf32>
    %61 = vector.extract_strided_slice %60 {offsets = [0, 0], sizes = [2, 96], strides = [1, 1]} : vector<2x128xf32> to vector<2x96xf32>
    %62 = arith.negf %61 : vector<2x96xf32>
    %63 = math.exp %62 : vector<2x96xf32>
    %cst_22 = arith.constant 1.000000e+00 : f32
    %64 = vector.broadcast %cst_22 : f32 to vector<2x96xf32>
    %65 = arith.addf %64, %63 : vector<2x96xf32>
    %66 = arith.divf %64, %65 : vector<2x96xf32>
    %67 = vector.extract_strided_slice %60 {offsets = [0, 96], sizes = [2, 32], strides = [1, 1]} : vector<2x128xf32> to vector<2x32xf32>
    %68 = math.tanh %67 : vector<2x32xf32>
    %69 = vector.extract_strided_slice %66 {offsets = [0, 0], sizes = [2, 32], strides = [1, 1]} : vector<2x96xf32> to vector<2x32xf32>
    %70 = vector.extract_strided_slice %66 {offsets = [0, 32], sizes = [2, 32], strides = [1, 1]} : vector<2x96xf32> to vector<2x32xf32>
    %71 = vector.extract_strided_slice %66 {offsets = [0, 64], sizes = [2, 32], strides = [1, 1]} : vector<2x96xf32> to vector<2x32xf32>
    %72 = arith.mulf %70, %55 : vector<2x32xf32>
    %73 = arith.mulf %69, %68 : vector<2x32xf32>
    %74 = arith.addf %72, %73 : vector<2x32xf32>
    %75 = math.tanh %74 : vector<2x32xf32>
    %76 = arith.mulf %71, %75 : vector<2x32xf32>
    %77 = vector.extract_strided_slice %17 {offsets = [6, 0], sizes = [2, 128], strides = [1, 1]} : vector<16x128xf32> to vector<2x128xf32>
    %cst_23 = arith.constant dense<0.000000e+00> : vector<2x128xf32>
    %78 = tpu.matmul %76, %1, %cst_23 {dimension_numbers = #tpu.dot_dimension_numbers<[1], [0], [0], [1], [0, 0, 1, 1], [], []>} : vector<2x32xf32>, vector<32x128xf32>, vector<2x128xf32> -> vector<2x128xf32>
    %79 = arith.addf %77, %78 : vector<2x128xf32>
    %80 = vector.extract_strided_slice %79 {offsets = [0, 0], sizes = [2, 96], strides = [1, 1]} : vector<2x128xf32> to vector<2x96xf32>
    %81 = arith.negf %80 : vector<2x96xf32>
    %82 = math.exp %81 : vector<2x96xf32>
    %cst_24 = arith.constant 1.000000e+00 : f32
    %83 = vector.broadcast %cst_24 : f32 to vector<2x96xf32>
    %84 = arith.addf %83, %82 : vector<2x96xf32>
    %85 = arith.divf %83, %84 : vector<2x96xf32>
    %86 = vector.extract_strided_slice %79 {offsets = [0, 96], sizes = [2, 32], strides = [1, 1]} : vector<2x128xf32> to vector<2x32xf32>
    %87 = math.tanh %86 : vector<2x32xf32>
    %88 = vector.extract_strided_slice %85 {offsets = [0, 0], sizes = [2, 32], strides = [1, 1]} : vector<2x96xf32> to vector<2x32xf32>
    %89 = vector.extract_strided_slice %85 {offsets = [0, 32], sizes = [2, 32], strides = [1, 1]} : vector<2x96xf32> to vector<2x32xf32>
    %90 = vector.extract_strided_slice %85 {offsets = [0, 64], sizes = [2, 32], strides = [1, 1]} : vector<2x96xf32> to vector<2x32xf32>
    %91 = arith.mulf %89, %74 : vector<2x32xf32>
    %92 = arith.mulf %88, %87 : vector<2x32xf32>
    %93 = arith.addf %91, %92 : vector<2x32xf32>
    %94 = math.tanh %93 : vector<2x32xf32>
    %95 = arith.mulf %90, %94 : vector<2x32xf32>
    %96 = vector.extract_strided_slice %17 {offsets = [8, 0], sizes = [2, 128], strides = [1, 1]} : vector<16x128xf32> to vector<2x128xf32>
    %cst_25 = arith.constant dense<0.000000e+00> : vector<2x128xf32>
    %97 = tpu.matmul %95, %1, %cst_25 {dimension_numbers = #tpu.dot_dimension_numbers<[1], [0], [0], [1], [0, 0, 1, 1], [], []>} : vector<2x32xf32>, vector<32x128xf32>, vector<2x128xf32> -> vector<2x128xf32>
    %98 = arith.addf %96, %97 : vector<2x128xf32>
    %99 = vector.extract_strided_slice %98 {offsets = [0, 0], sizes = [2, 96], strides = [1, 1]} : vector<2x128xf32> to vector<2x96xf32>
    %100 = arith.negf %99 : vector<2x96xf32>
    %101 = math.exp %100 : vector<2x96xf32>
    %cst_26 = arith.constant 1.000000e+00 : f32
    %102 = vector.broadcast %cst_26 : f32 to vector<2x96xf32>
    %103 = arith.addf %102, %101 : vector<2x96xf32>
    %104 = arith.divf %102, %103 : vector<2x96xf32>
    %105 = vector.extract_strided_slice %98 {offsets = [0, 96], sizes = [2, 32], strides = [1, 1]} : vector<2x128xf32> to vector<2x32xf32>
    %106 = math.tanh %105 : vector<2x32xf32>
    %107 = vector.extract_strided_slice %104 {offsets = [0, 0], sizes = [2, 32], strides = [1, 1]} : vector<2x96xf32> to vector<2x32xf32>
    %108 = vector.extract_strided_slice %104 {offsets = [0, 32], sizes = [2, 32], strides = [1, 1]} : vector<2x96xf32> to vector<2x32xf32>
    %109 = vector.extract_strided_slice %104 {offsets = [0, 64], sizes = [2, 32], strides = [1, 1]} : vector<2x96xf32> to vector<2x32xf32>
    %110 = arith.mulf %108, %93 : vector<2x32xf32>
    %111 = arith.mulf %107, %106 : vector<2x32xf32>
    %112 = arith.addf %110, %111 : vector<2x32xf32>
    %113 = math.tanh %112 : vector<2x32xf32>
    %114 = arith.mulf %109, %113 : vector<2x32xf32>
    %115 = vector.extract_strided_slice %17 {offsets = [10, 0], sizes = [2, 128], strides = [1, 1]} : vector<16x128xf32> to vector<2x128xf32>
    %cst_27 = arith.constant dense<0.000000e+00> : vector<2x128xf32>
    %116 = tpu.matmul %114, %1, %cst_27 {dimension_numbers = #tpu.dot_dimension_numbers<[1], [0], [0], [1], [0, 0, 1, 1], [], []>} : vector<2x32xf32>, vector<32x128xf32>, vector<2x128xf32> -> vector<2x128xf32>
    %117 = arith.addf %115, %116 : vector<2x128xf32>
    %118 = vector.extract_strided_slice %117 {offsets = [0, 0], sizes = [2, 96], strides = [1, 1]} : vector<2x128xf32> to vector<2x96xf32>
    %119 = arith.negf %118 : vector<2x96xf32>
    %120 = math.exp %119 : vector<2x96xf32>
    %cst_28 = arith.constant 1.000000e+00 : f32
    %121 = vector.broadcast %cst_28 : f32 to vector<2x96xf32>
    %122 = arith.addf %121, %120 : vector<2x96xf32>
    %123 = arith.divf %121, %122 : vector<2x96xf32>
    %124 = vector.extract_strided_slice %117 {offsets = [0, 96], sizes = [2, 32], strides = [1, 1]} : vector<2x128xf32> to vector<2x32xf32>
    %125 = math.tanh %124 : vector<2x32xf32>
    %126 = vector.extract_strided_slice %123 {offsets = [0, 0], sizes = [2, 32], strides = [1, 1]} : vector<2x96xf32> to vector<2x32xf32>
    %127 = vector.extract_strided_slice %123 {offsets = [0, 32], sizes = [2, 32], strides = [1, 1]} : vector<2x96xf32> to vector<2x32xf32>
    %128 = vector.extract_strided_slice %123 {offsets = [0, 64], sizes = [2, 32], strides = [1, 1]} : vector<2x96xf32> to vector<2x32xf32>
    %129 = arith.mulf %127, %112 : vector<2x32xf32>
    %130 = arith.mulf %126, %125 : vector<2x32xf32>
    %131 = arith.addf %129, %130 : vector<2x32xf32>
    %132 = math.tanh %131 : vector<2x32xf32>
    %133 = arith.mulf %128, %132 : vector<2x32xf32>
    %134 = vector.extract_strided_slice %17 {offsets = [12, 0], sizes = [2, 128], strides = [1, 1]} : vector<16x128xf32> to vector<2x128xf32>
    %cst_29 = arith.constant dense<0.000000e+00> : vector<2x128xf32>
    %135 = tpu.matmul %133, %1, %cst_29 {dimension_numbers = #tpu.dot_dimension_numbers<[1], [0], [0], [1], [0, 0, 1, 1], [], []>} : vector<2x32xf32>, vector<32x128xf32>, vector<2x128xf32> -> vector<2x128xf32>
    %136 = arith.addf %134, %135 : vector<2x128xf32>
    %137 = vector.extract_strided_slice %136 {offsets = [0, 0], sizes = [2, 96], strides = [1, 1]} : vector<2x128xf32> to vector<2x96xf32>
    %138 = arith.negf %137 : vector<2x96xf32>
    %139 = math.exp %138 : vector<2x96xf32>
    %cst_30 = arith.constant 1.000000e+00 : f32
    %140 = vector.broadcast %cst_30 : f32 to vector<2x96xf32>
    %141 = arith.addf %140, %139 : vector<2x96xf32>
    %142 = arith.divf %140, %141 : vector<2x96xf32>
    %143 = vector.extract_strided_slice %136 {offsets = [0, 96], sizes = [2, 32], strides = [1, 1]} : vector<2x128xf32> to vector<2x32xf32>
    %144 = math.tanh %143 : vector<2x32xf32>
    %145 = vector.extract_strided_slice %142 {offsets = [0, 0], sizes = [2, 32], strides = [1, 1]} : vector<2x96xf32> to vector<2x32xf32>
    %146 = vector.extract_strided_slice %142 {offsets = [0, 32], sizes = [2, 32], strides = [1, 1]} : vector<2x96xf32> to vector<2x32xf32>
    %147 = vector.extract_strided_slice %142 {offsets = [0, 64], sizes = [2, 32], strides = [1, 1]} : vector<2x96xf32> to vector<2x32xf32>
    %148 = arith.mulf %146, %131 : vector<2x32xf32>
    %149 = arith.mulf %145, %144 : vector<2x32xf32>
    %150 = arith.addf %148, %149 : vector<2x32xf32>
    %151 = math.tanh %150 : vector<2x32xf32>
    %152 = arith.mulf %147, %151 : vector<2x32xf32>
    %153 = vector.extract_strided_slice %17 {offsets = [14, 0], sizes = [2, 128], strides = [1, 1]} : vector<16x128xf32> to vector<2x128xf32>
    %cst_31 = arith.constant dense<0.000000e+00> : vector<2x128xf32>
    %154 = tpu.matmul %152, %1, %cst_31 {dimension_numbers = #tpu.dot_dimension_numbers<[1], [0], [0], [1], [0, 0, 1, 1], [], []>} : vector<2x32xf32>, vector<32x128xf32>, vector<2x128xf32> -> vector<2x128xf32>
    %155 = arith.addf %153, %154 : vector<2x128xf32>
    %156 = vector.extract_strided_slice %155 {offsets = [0, 0], sizes = [2, 96], strides = [1, 1]} : vector<2x128xf32> to vector<2x96xf32>
    %157 = arith.negf %156 : vector<2x96xf32>
    %158 = math.exp %157 : vector<2x96xf32>
    %cst_32 = arith.constant 1.000000e+00 : f32
    %159 = vector.broadcast %cst_32 : f32 to vector<2x96xf32>
    %160 = arith.addf %159, %158 : vector<2x96xf32>
    %161 = arith.divf %159, %160 : vector<2x96xf32>
    %162 = vector.extract_strided_slice %155 {offsets = [0, 96], sizes = [2, 32], strides = [1, 1]} : vector<2x128xf32> to vector<2x32xf32>
    %163 = math.tanh %162 : vector<2x32xf32>
    %164 = vector.extract_strided_slice %161 {offsets = [0, 0], sizes = [2, 32], strides = [1, 1]} : vector<2x96xf32> to vector<2x32xf32>
    %165 = vector.extract_strided_slice %161 {offsets = [0, 32], sizes = [2, 32], strides = [1, 1]} : vector<2x96xf32> to vector<2x32xf32>
    %166 = vector.extract_strided_slice %161 {offsets = [0, 64], sizes = [2, 32], strides = [1, 1]} : vector<2x96xf32> to vector<2x32xf32>
    %167 = arith.mulf %165, %150 : vector<2x32xf32>
    %168 = arith.mulf %164, %163 : vector<2x32xf32>
    %169 = arith.addf %167, %168 : vector<2x32xf32>
    %170 = math.tanh %169 : vector<2x32xf32>
    %171 = arith.mulf %166, %170 : vector<2x32xf32>
    %cst_33 = arith.constant dense<0.000000e+00> : vector<2x128xf32>
    %172 = tpu.matmul %171, %3, %cst_33 {dimension_numbers = #tpu.dot_dimension_numbers<[1], [0], [0], [1], [0, 0, 1, 1], [], []>} : vector<2x32xf32>, vector<32x128xf32>, vector<2x128xf32> -> vector<2x128xf32>
    %173 = vector.broadcast %5 : vector<1x128xf32> to vector<2x128xf32>
    %174 = arith.addf %172, %173 : vector<2x128xf32>
    %175 = vector.extract_strided_slice %11 {offsets = [14, 3], sizes = [2, 1], strides = [1, 1]} : vector<16x5xf32> to vector<2x1xf32>
    %176 = tpu.iota {dimensions = array<i32: 1>} : vector<2x4xi32>
    %cst_34 = arith.constant 0.000000e+00 : f32
    %177 = vector.broadcast %cst_34 : f32 to vector<2x4xf32>
    %178 = vector.broadcast %175 : vector<2x1xf32> to vector<2x16xf32>
    %179 = vector.broadcast %6 : vector<1x16xf32> to vector<2x16xf32>
    %180 = arith.mulf %178, %179 : vector<2x16xf32>
    %181 = vector.broadcast %7 : vector<1x16xf32> to vector<2x16xf32>
    %182 = arith.addf %180, %181 : vector<2x16xf32>
    %cst_35 = arith.constant 0.000000e+00 : f32
    %183 = vector.broadcast %cst_35 : f32 to vector<2x16xf32>
    %184 = arith.maximumf %182, %183 : vector<2x16xf32>
    %cst_36 = arith.constant dense<0.000000e+00> : vector<2x128xf32>
    %185 = tpu.matmul %184, %2, %cst_36 {dimension_numbers = #tpu.dot_dimension_numbers<[1], [0], [0], [1], [0, 0, 1, 1], [], []>} : vector<2x16xf32>, vector<16x128xf32>, vector<2x128xf32> -> vector<2x128xf32>
    %186 = arith.addf %174, %185 : vector<2x128xf32>
    %187 = vector.extract_strided_slice %186 {offsets = [0, 0], sizes = [2, 96], strides = [1, 1]} : vector<2x128xf32> to vector<2x96xf32>
    %188 = arith.negf %187 : vector<2x96xf32>
    %189 = math.exp %188 : vector<2x96xf32>
    %cst_37 = arith.constant 1.000000e+00 : f32
    %190 = vector.broadcast %cst_37 : f32 to vector<2x96xf32>
    %191 = arith.addf %190, %189 : vector<2x96xf32>
    %192 = arith.divf %190, %191 : vector<2x96xf32>
    %193 = vector.extract_strided_slice %186 {offsets = [0, 96], sizes = [2, 32], strides = [1, 1]} : vector<2x128xf32> to vector<2x32xf32>
    %194 = math.tanh %193 : vector<2x32xf32>
    %195 = vector.extract_strided_slice %192 {offsets = [0, 0], sizes = [2, 32], strides = [1, 1]} : vector<2x96xf32> to vector<2x32xf32>
    %196 = vector.extract_strided_slice %192 {offsets = [0, 32], sizes = [2, 32], strides = [1, 1]} : vector<2x96xf32> to vector<2x32xf32>
    %197 = vector.extract_strided_slice %192 {offsets = [0, 64], sizes = [2, 32], strides = [1, 1]} : vector<2x96xf32> to vector<2x32xf32>
    %198 = arith.mulf %196, %169 : vector<2x32xf32>
    %199 = arith.mulf %195, %194 : vector<2x32xf32>
    %200 = arith.addf %198, %199 : vector<2x32xf32>
    %201 = math.tanh %200 : vector<2x32xf32>
    %202 = arith.mulf %197, %201 : vector<2x32xf32>
    %203 = vector.broadcast %8 : vector<1x32xf32> to vector<2x32xf32>
    %204 = arith.mulf %202, %203 : vector<2x32xf32>
    %cst_38 = arith.constant dense<0.000000e+00> : vector<2xf32>
    %205 = vector.multi_reduction <add>, %204, %cst_38 [1] : vector<2x32xf32> to vector<2xf32>
    %206 = vector.shape_cast %205 : vector<2xf32> to vector<2x1xf32>
    %207 = vector.broadcast %9 : vector<1x1xf32> to vector<2x1xf32>
    %208 = arith.addf %206, %207 : vector<2x1xf32>
    %c0_i32 = arith.constant 0 : i32
    %209 = vector.broadcast %c0_i32 : i32 to vector<2x4xi32>
    %210 = arith.cmpi eq, %176, %209 : vector<2x4xi32>
    %211 = vector.shape_cast %208 : vector<2x1xf32> to vector<2x1xf32>
    %212 = vector.broadcast %211 : vector<2x1xf32> to vector<2x4xf32>
    %213 = arith.select %210, %212, %177 : vector<2x4xi1>, vector<2x4xf32>
    %214 = vector.broadcast %208 : vector<2x1xf32> to vector<2x16xf32>
    %215 = vector.broadcast %6 : vector<1x16xf32> to vector<2x16xf32>
    %216 = arith.mulf %214, %215 : vector<2x16xf32>
    %217 = vector.broadcast %7 : vector<1x16xf32> to vector<2x16xf32>
    %218 = arith.addf %216, %217 : vector<2x16xf32>
    %cst_39 = arith.constant 0.000000e+00 : f32
    %219 = vector.broadcast %cst_39 : f32 to vector<2x16xf32>
    %220 = arith.maximumf %218, %219 : vector<2x16xf32>
    %cst_40 = arith.constant dense<0.000000e+00> : vector<2x128xf32>
    %221 = tpu.matmul %220, %2, %cst_40 {dimension_numbers = #tpu.dot_dimension_numbers<[1], [0], [0], [1], [0, 0, 1, 1], [], []>} : vector<2x16xf32>, vector<16x128xf32>, vector<2x128xf32> -> vector<2x128xf32>
    %222 = arith.addf %174, %221 : vector<2x128xf32>
    %223 = vector.extract_strided_slice %222 {offsets = [0, 0], sizes = [2, 96], strides = [1, 1]} : vector<2x128xf32> to vector<2x96xf32>
    %224 = arith.negf %223 : vector<2x96xf32>
    %225 = math.exp %224 : vector<2x96xf32>
    %cst_41 = arith.constant 1.000000e+00 : f32
    %226 = vector.broadcast %cst_41 : f32 to vector<2x96xf32>
    %227 = arith.addf %226, %225 : vector<2x96xf32>
    %228 = arith.divf %226, %227 : vector<2x96xf32>
    %229 = vector.extract_strided_slice %222 {offsets = [0, 96], sizes = [2, 32], strides = [1, 1]} : vector<2x128xf32> to vector<2x32xf32>
    %230 = math.tanh %229 : vector<2x32xf32>
    %231 = vector.extract_strided_slice %228 {offsets = [0, 0], sizes = [2, 32], strides = [1, 1]} : vector<2x96xf32> to vector<2x32xf32>
    %232 = vector.extract_strided_slice %228 {offsets = [0, 32], sizes = [2, 32], strides = [1, 1]} : vector<2x96xf32> to vector<2x32xf32>
    %233 = vector.extract_strided_slice %228 {offsets = [0, 64], sizes = [2, 32], strides = [1, 1]} : vector<2x96xf32> to vector<2x32xf32>
    %234 = arith.mulf %232, %169 : vector<2x32xf32>
    %235 = arith.mulf %231, %230 : vector<2x32xf32>
    %236 = arith.addf %234, %235 : vector<2x32xf32>
    %237 = math.tanh %236 : vector<2x32xf32>
    %238 = arith.mulf %233, %237 : vector<2x32xf32>
    %239 = vector.broadcast %8 : vector<1x32xf32> to vector<2x32xf32>
    %240 = arith.mulf %238, %239 : vector<2x32xf32>
    %cst_42 = arith.constant dense<0.000000e+00> : vector<2xf32>
    %241 = vector.multi_reduction <add>, %240, %cst_42 [1] : vector<2x32xf32> to vector<2xf32>
    %242 = vector.shape_cast %241 : vector<2xf32> to vector<2x1xf32>
    %243 = vector.broadcast %9 : vector<1x1xf32> to vector<2x1xf32>
    %244 = arith.addf %242, %243 : vector<2x1xf32>
    %c1_i32 = arith.constant 1 : i32
    %245 = vector.broadcast %c1_i32 : i32 to vector<2x4xi32>
    %246 = arith.cmpi eq, %176, %245 : vector<2x4xi32>
    %247 = vector.shape_cast %244 : vector<2x1xf32> to vector<2x1xf32>
    %248 = vector.broadcast %247 : vector<2x1xf32> to vector<2x4xf32>
    %249 = arith.select %246, %248, %213 : vector<2x4xi1>, vector<2x4xf32>
    %250 = vector.broadcast %244 : vector<2x1xf32> to vector<2x16xf32>
    %251 = vector.broadcast %6 : vector<1x16xf32> to vector<2x16xf32>
    %252 = arith.mulf %250, %251 : vector<2x16xf32>
    %253 = vector.broadcast %7 : vector<1x16xf32> to vector<2x16xf32>
    %254 = arith.addf %252, %253 : vector<2x16xf32>
    %cst_43 = arith.constant 0.000000e+00 : f32
    %255 = vector.broadcast %cst_43 : f32 to vector<2x16xf32>
    %256 = arith.maximumf %254, %255 : vector<2x16xf32>
    %cst_44 = arith.constant dense<0.000000e+00> : vector<2x128xf32>
    %257 = tpu.matmul %256, %2, %cst_44 {dimension_numbers = #tpu.dot_dimension_numbers<[1], [0], [0], [1], [0, 0, 1, 1], [], []>} : vector<2x16xf32>, vector<16x128xf32>, vector<2x128xf32> -> vector<2x128xf32>
    %258 = arith.addf %174, %257 : vector<2x128xf32>
    %259 = vector.extract_strided_slice %258 {offsets = [0, 0], sizes = [2, 96], strides = [1, 1]} : vector<2x128xf32> to vector<2x96xf32>
    %260 = arith.negf %259 : vector<2x96xf32>
    %261 = math.exp %260 : vector<2x96xf32>
    %cst_45 = arith.constant 1.000000e+00 : f32
    %262 = vector.broadcast %cst_45 : f32 to vector<2x96xf32>
    %263 = arith.addf %262, %261 : vector<2x96xf32>
    %264 = arith.divf %262, %263 : vector<2x96xf32>
    %265 = vector.extract_strided_slice %258 {offsets = [0, 96], sizes = [2, 32], strides = [1, 1]} : vector<2x128xf32> to vector<2x32xf32>
    %266 = math.tanh %265 : vector<2x32xf32>
    %267 = vector.extract_strided_slice %264 {offsets = [0, 0], sizes = [2, 32], strides = [1, 1]} : vector<2x96xf32> to vector<2x32xf32>
    %268 = vector.extract_strided_slice %264 {offsets = [0, 32], sizes = [2, 32], strides = [1, 1]} : vector<2x96xf32> to vector<2x32xf32>
    %269 = vector.extract_strided_slice %264 {offsets = [0, 64], sizes = [2, 32], strides = [1, 1]} : vector<2x96xf32> to vector<2x32xf32>
    %270 = arith.mulf %268, %169 : vector<2x32xf32>
    %271 = arith.mulf %267, %266 : vector<2x32xf32>
    %272 = arith.addf %270, %271 : vector<2x32xf32>
    %273 = math.tanh %272 : vector<2x32xf32>
    %274 = arith.mulf %269, %273 : vector<2x32xf32>
    %275 = vector.broadcast %8 : vector<1x32xf32> to vector<2x32xf32>
    %276 = arith.mulf %274, %275 : vector<2x32xf32>
    %cst_46 = arith.constant dense<0.000000e+00> : vector<2xf32>
    %277 = vector.multi_reduction <add>, %276, %cst_46 [1] : vector<2x32xf32> to vector<2xf32>
    %278 = vector.shape_cast %277 : vector<2xf32> to vector<2x1xf32>
    %279 = vector.broadcast %9 : vector<1x1xf32> to vector<2x1xf32>
    %280 = arith.addf %278, %279 : vector<2x1xf32>
    %c2_i32 = arith.constant 2 : i32
    %281 = vector.broadcast %c2_i32 : i32 to vector<2x4xi32>
    %282 = arith.cmpi eq, %176, %281 : vector<2x4xi32>
    %283 = vector.shape_cast %280 : vector<2x1xf32> to vector<2x1xf32>
    %284 = vector.broadcast %283 : vector<2x1xf32> to vector<2x4xf32>
    %285 = arith.select %282, %284, %249 : vector<2x4xi1>, vector<2x4xf32>
    %286 = vector.broadcast %280 : vector<2x1xf32> to vector<2x16xf32>
    %287 = vector.broadcast %6 : vector<1x16xf32> to vector<2x16xf32>
    %288 = arith.mulf %286, %287 : vector<2x16xf32>
    %289 = vector.broadcast %7 : vector<1x16xf32> to vector<2x16xf32>
    %290 = arith.addf %288, %289 : vector<2x16xf32>
    %cst_47 = arith.constant 0.000000e+00 : f32
    %291 = vector.broadcast %cst_47 : f32 to vector<2x16xf32>
    %292 = arith.maximumf %290, %291 : vector<2x16xf32>
    %cst_48 = arith.constant dense<0.000000e+00> : vector<2x128xf32>
    %293 = tpu.matmul %292, %2, %cst_48 {dimension_numbers = #tpu.dot_dimension_numbers<[1], [0], [0], [1], [0, 0, 1, 1], [], []>} : vector<2x16xf32>, vector<16x128xf32>, vector<2x128xf32> -> vector<2x128xf32>
    %294 = arith.addf %174, %293 : vector<2x128xf32>
    %295 = vector.extract_strided_slice %294 {offsets = [0, 0], sizes = [2, 96], strides = [1, 1]} : vector<2x128xf32> to vector<2x96xf32>
    %296 = arith.negf %295 : vector<2x96xf32>
    %297 = math.exp %296 : vector<2x96xf32>
    %cst_49 = arith.constant 1.000000e+00 : f32
    %298 = vector.broadcast %cst_49 : f32 to vector<2x96xf32>
    %299 = arith.addf %298, %297 : vector<2x96xf32>
    %300 = arith.divf %298, %299 : vector<2x96xf32>
    %301 = vector.extract_strided_slice %294 {offsets = [0, 96], sizes = [2, 32], strides = [1, 1]} : vector<2x128xf32> to vector<2x32xf32>
    %302 = math.tanh %301 : vector<2x32xf32>
    %303 = vector.extract_strided_slice %300 {offsets = [0, 0], sizes = [2, 32], strides = [1, 1]} : vector<2x96xf32> to vector<2x32xf32>
    %304 = vector.extract_strided_slice %300 {offsets = [0, 32], sizes = [2, 32], strides = [1, 1]} : vector<2x96xf32> to vector<2x32xf32>
    %305 = vector.extract_strided_slice %300 {offsets = [0, 64], sizes = [2, 32], strides = [1, 1]} : vector<2x96xf32> to vector<2x32xf32>
    %306 = arith.mulf %304, %169 : vector<2x32xf32>
    %307 = arith.mulf %303, %302 : vector<2x32xf32>
    %308 = arith.addf %306, %307 : vector<2x32xf32>
    %309 = math.tanh %308 : vector<2x32xf32>
    %310 = arith.mulf %305, %309 : vector<2x32xf32>
    %311 = vector.broadcast %8 : vector<1x32xf32> to vector<2x32xf32>
    %312 = arith.mulf %310, %311 : vector<2x32xf32>
    %cst_50 = arith.constant dense<0.000000e+00> : vector<2xf32>
    %313 = vector.multi_reduction <add>, %312, %cst_50 [1] : vector<2x32xf32> to vector<2xf32>
    %314 = vector.shape_cast %313 : vector<2xf32> to vector<2x1xf32>
    %315 = vector.broadcast %9 : vector<1x1xf32> to vector<2x1xf32>
    %316 = arith.addf %314, %315 : vector<2x1xf32>
    %c3_i32 = arith.constant 3 : i32
    %317 = vector.broadcast %c3_i32 : i32 to vector<2x4xi32>
    %318 = arith.cmpi eq, %176, %317 : vector<2x4xi32>
    %319 = vector.shape_cast %316 : vector<2x1xf32> to vector<2x1xf32>
    %320 = vector.broadcast %319 : vector<2x1xf32> to vector<2x4xf32>
    %321 = arith.select %318, %320, %285 : vector<2x4xi1>, vector<2x4xf32>
    %c0_51 = arith.constant 0 : index
    %c0_52 = arith.constant 0 : index
    %322 = vector.load %arg2[%c0_51, %c0_52] : memref<2x4xf32, #tpu.memory_space<vmem>>, vector<2x4xf32>
    tpu.vector_store %arg2[%c0_51, %c0_52], %321 {strides = array<i32>} : memref<2x4xf32, #tpu.memory_space<vmem>>, vector<2x4xf32>,
    return
  }
}

</mosaic_0001>

<bundles_post_ra>
// kernel: tpu_custom_call.1
= control target key start
LH: loop header
LB: loop body
LE: loop exit
PB: predicated region body
PF: predicated region fallthrough
CT: control target
= control target key end

     0   :  { %7 = vsyncpa [#allocation3], 0  ;;  %s2384_s0 = inlined_call_operand.vmem [shape: f32[16,5], index: 0, kind: input, shape index: {}]   ;;  %s2385_s1 = inlined_call_operand.hbm [shape: f32[112,128], index: 1, kind: input, shape index: {}]   ;;  %s2386_s2 = inlined_call_operand.hbm [shape: f32[2,4], index: 2, kind: output, shape index: {}]  }
   0x1   :  { %8 = vsyncpa [#allocation4], 0  ;;  %s2126_s9 = smov [#allocation2]   ;;  %s2078_s13 = scalar_lea.hbm %s2385_s1, 1792 }
   0x2   :  { %s16_s10 = sshll.u32 %s2126_s9, 4  ;;  %p2079_p0 = scmp.ne.s32.totalorder %s2385_s1, %s2078_s13  ;;  %s17_s10 = int_to_ptr.vmem [resolvable:$true] %s16_s10 }
   0x3   :  { %p2082_p1 = scmp.lt.u32.totalorder %s2078_s13, %s2385_s1 }
   0x5   :  { %p2084_p2 = pnand %p2082_p1, %p2079_p0 }
   0x7   :  { %2087 = shalt.err (!%p2084_p2)
}
   0x8   :  { %s2088_s18 = scalar_lea.vmem %s17_s10, 1792  ;;  %p2093_p4 = scmp.lt.s32.totalorder %s17_s10, %s17_s10 }
   0x9   :  { %p2089_p3 = scmp.ne.s32.totalorder %s17_s10, %s2088_s18  ;;  %p2094_p5 = scmp.lt.s32.totalorder %s2088_s18, %s2088_s18 }
   0xb   :  { %p2095_p6 = por %p2094_p5, %p2093_p4 }
   0xd   :  { %p2096_p7 = pnand %p2095_p6, %p2089_p3 }
   0xf   :  { %2099 = shalt.err (!%p2096_p7)
}
  0x10   :  { %s2127_s19 = smov 128   ;;  %s2128_s20 = smov 8  }
  0x11   :  { %22 = dma.hbm_to_vmem [thread:$0]  %s2385_s1, 1792, %s17_s10, [#allocation3], %s2127_s19, %s2127_s19, %s2128_s20  }
  0x12   :  { %2122 = dma.done.wait [#allocation3], 1792  }
  0x13   :  { %2123 = vsyncadd [#allocation3], 4294965504  ;;  %vm54_vm0 = vcmask 1044480   ;;  %vm47_vm1 = vcmask 39936   ;;  %v44_v0 = vld [vmem:[#allocation2 + $0x66] sm:$0x1f] }
  0x14   :  { %v45_v1 = vld [vmem:[%s2384_s0] sm:$0xff]  ;;  %v2170_v2 = vld [vmem:[%s2384_s0 + $0x8] sm:$0xff]  ;;  %1759 = vmatprep.subr.msk.mxu0 %vm54_vm0, %v44_v0  ;;  %v2129_v3 = vmov 0.0|0.0   ;;  %v28_v4 = vld [vmem:[#allocation2 + $0x10] sm:$0xff]  ;;  %vm2130_vm2 = vmmov 0   ;;  %v2131_v13 = vmov 0.0  }
  0x15   :  { %1761 = vmatprep.mubr.msk.f32.mxu0 %vm47_vm1, %v45_v1  ;;  %1760 = vmatpush3.msk.msra.mxu0 %vm54_vm0, %v44_v0  ;;  %v29_v5 = vld [vmem:[#allocation2 + $0x18] sm:$0xff]  ;;  %v26_v7 = vld [vmem:[#allocation2] sm:$0xff]  ;;  %v27_v8 = vld [vmem:[#allocation2 + $0x8] sm:$0xff]  ;;  %vm139_vm3 = vcmask 130048   ;;  %s2132_s0 = smov 32   ;;  %s2133_s1 = smov 64  }
  0x16   :  { %1762 = vmatmul.mubr.msk.f32.vlgmr.msra.gmra.mrb[0].mxu0 %vm47_vm1, %v2170_v2  ;;  %1902 = vmatprep.subr.bf16.mxu0 %v2129_v3  ;;  %v2174_v6 = vpack.c.bf16 %v29_v5, %v28_v4  ;;  %v1898_v9 = vpack.c.bf16 %v27_v8, %v26_v7  ;;  %v30_v10 = vld [vmem:[#allocation2 + $0x20] sm:$0xff]  ;;  %v31_v11 = vld [vmem:[#allocation2 + $0x28] sm:$0xff]  ;;  %vm221_vm4 = vcmask 261120   ;;  %vm1276_vm5 = vcmask 254976   ;;  %s2136_s27 = smov [#allocation5]  }
  0x17   :  { %v2178_v12 = vpack.c.bf16 %v31_v11, %v30_v10  ;;  %1779 = vmatprep.mubr.msk.f32.mxu0 %vm2130_vm2, %v2131_v13  ;;  %v1663_v20 = vld [vmem:[#allocation2 + $0x60] ss:$0 sm:$0xff]  ;;  %s1651_s28 = sshll.u32 %s2136_s27, 4  ;;  %vm1643_vm10 = vcmask 25600   ;;  %s1652_s28 = int_to_ptr.vmem [resolvable:$true] %s1651_s28 }
  0x18   :  { %1904 = vmatpush3.bf16.msra.mxu0 %v2174_v6  ;;  %1899 = vmatprep.subr.bf16.mxu1 %v1898_v9  ;;  %s2100_s29 = scalar_lea.vmem %s1652_s28, 32  ;;  %p2105_p9 = scmp.lt.s32.totalorder %s1652_s28, %s1652_s28 }
  0x19   :  { %1905 = vmatprep.subr.bf16.mxu0 %v2129_v3  ;;  %1901 = vmatpush3.bf16.msra.mxu1 %v1898_v9  ;;  %p2101_p8 = scmp.ne.s32.totalorder %s1652_s28, %s2100_s29  ;;  %p2106_p10 = scmp.lt.s32.totalorder %s2100_s29, %s2100_s29 }
  0x1a   :  { %1908 = vmatprep.subr.bf16.mxu1 %v2129_v3 }
  0x1b   :  { %p2107_p11 = por %p2106_p10, %p2105_p9 }
  0x1c   :  { %1907 = vmatpush3.bf16.msra.mxu0 %v2178_v12 }
  0x1d   :  { %1914 = vmatprep.subr.bf16.mxu0 %v2129_v3  ;;  %p2108_p12 = pnand %p2107_p11, %p2101_p8 }
  0x1f   :  { %1780 = vmatmul.mubr.f32.vlgmr.msra.gmra.mrb[2].mxu0 %v2131_v13 }
  0x20   :  { %1916 = vmatpush3.bf16.msra.mxu0 %v2174_v6  ;;  %1801 = vmatprep.mubr.msk.f32.mxu0 %vm2130_vm2, %v2131_v13 }
  0x21   :  { %1917 = vmatprep.subr.bf16.mxu0 %v2129_v3 }
  0x24   :  { %1919 = vmatpush3.bf16.msra.mxu0 %v2178_v12 }
  0x25   :  { %1926 = vmatprep.subr.bf16.mxu0 %v2129_v3 }
  0xe9   :  { %v1763_v14 = vpop.f32.mrb[0].mxu0 }
  0xea   :  { %v124_v15 = vpop.f32.mrb[1].mxu0  ;;  %v134_v17 = vmax.f32 %v1763_v14, 0.0 }
  0xeb   :  { %v133_v16 = vmax.f32 %v124_v15, 0.0 }
  0xed   :  { %1768 = vmatprep.mubr.msk.f32.mxu1 %vm139_vm3, %v133_v16 }
  0xee   :  { %1769 = vmatmul.mubr.msk.f32.vlgmr.msra.gmra.mrb[0].mxu1 %vm139_vm3, %v134_v17 }
  0xef   :  { %1910 = vmatpush3.bf16.msra.mxu1 %v2174_v6  ;;  %1790 = vmatprep.mubr.msk.f32.mxu1 %vm2130_vm2, %v2131_v13 }
  0xf0   :  { %1911 = vmatprep.subr.bf16.mxu1 %v2129_v3 }
  0xf2   :  { %v291_v18 = vpop.f32.mrb[2].mxu0 }
  0xf3   :  { %1913 = vmatpush3.bf16.msra.mxu1 %v2178_v12  ;;  %v1781_v19 = vpop.f32.mrb[3].mxu0 }
  0xf4   :  { %1920 = vmatprep.subr.bf16.mxu1 %v2129_v3 }
 0x1c1   :  { %v1770_v21 = vpop.f32.mrb[0].mxu1 }
 0x1c2   :  { %v2200_v22 = vadd.f32 %v1770_v21, %v1663_v20  ;;  %v212_v23 = vpop.f32.mrb[1].mxu1 }
 0x1c3   :  { %v2202_v24 = vadd.f32 %v1663_v20, %v212_v23 }
 0x1c5   :  { %v295_v25 = vadd.f32 %v291_v18, %v2202_v24 }
 0x1c7   :  { %1982 = vtanh.f32 %v295_v25  ;;  %v1666_v27 = vmul.f32 -1.442695, %v295_v25 }
 0x1c9   :  { %1984 = vpow2.f32 %v1666_v27 }
 0x1d1   :  { %v1983_v26 = vpop.eup %1982 }
 0x1d2   :  { %305 = vrot.lane.b32.xlu0 %v1983_v26, %s2132_s0 }
 0x1d3   :  { %v1985_v28 = vpop.eup %1984 }
 0x1d4   :  { %v299_v29 = vadd.f32 1.0, %v1985_v28 }
 0x1d6   :  { %1986 = vrcp.f32 %v299_v29 }
 0x1e0   :  { %v1987_v30 = vpop.eup %1986 }
 0x1e1   :  { %v303_v33 = vmul.f32 0.0, %v1987_v30 }
 0x244   :  { %v306_v31 = vpop.permute.xlu0 %305 }
 0x245   :  { %v308_v32 = vmul.f32 %v1987_v30, %v306_v31 }
 0x247   :  { %310 = vrot.lane.b32.xlu0 %v308_v32, %s2132_s0 }
 0x2b9   :  { %v311_v34 = vpop.permute.xlu0 %310 }
 0x2ba   :  { %v313_v35 = vadd.f32 %v311_v34, %v303_v33 }
 0x2bc   :  { %1988 = vtanh.f32 %v313_v35  ;;  %v407_v51 = vrot.slane %v313_v35, 6 }
 0x2c6   :  { %v1989_v36 = vpop.eup %1988 }
 0x2c7   :  { %316 = vrot.lane.b32.xlu1 %v1989_v36, %s2132_s0 }
 0x339   :  { %v317_v37 = vpop.permute.xlu1 %316 }
 0x33a   :  { %v319_v38 = vmul.f32 %v1987_v30, %v317_v37 }
 0x33c   :  { %321 = vrot.lane.b32.xlu1 %v319_v38, %s2133_s1 }
 0x3ae   :  { %v322_v39 = vpop.permute.xlu1 %321 }
 0x3af   :  { %1791 = vmatmul.mubr.msk.f32.vlgmr.msra.gmra.mrb[2].mxu1 %vm221_vm4, %v322_v39 }
 0x3b0   :  { %1922 = vmatpush3.bf16.msra.mxu1 %v2174_v6  ;;  %1812 = vmatprep.mubr.msk.f32.mxu1 %vm2130_vm2, %v2131_v13 }
 0x3b1   :  { %1923 = vmatprep.subr.bf16.mxu1 %v2129_v3 }
 0x3b4   :  { %1925 = vmatpush3.bf16.msra.mxu1 %v2178_v12 }
 0x3b5   :  { %1932 = vmatprep.subr.bf16.mxu1 %v2129_v3 }
 0x482   :  { %v391_v40 = vpop.f32.mrb[2].mxu1 }
 0x483   :  { %v396_v41 = vrot.slane %v391_v40, 6  ;;  %v1792_v42 = vpop.f32.mrb[3].mxu1 }
 0x485   :  { %v398_v43 = vadd.f32 %v396_v41, %v2202_v24 }
 0x487   :  { %1990 = vtanh.f32 %v398_v43  ;;  %v1668_v45 = vmul.f32 -1.442695, %v398_v43 }
 0x489   :  { %1992 = vpow2.f32 %v1668_v45 }
 0x491   :  { %v1991_v44 = vpop.eup %1990 }
 0x492   :  { %411 = vrot.lane.b32.xlu0 %v1991_v44, %s2132_s0 }
 0x493   :  { %v1993_v46 = vpop.eup %1992 }
 0x494   :  { %v402_v47 = vadd.f32 1.0, %v1993_v46 }
 0x496   :  { %1994 = vrcp.f32 %v402_v47 }
 0x4a0   :  { %v1995_v48 = vpop.eup %1994 }
 0x4a1   :  { %v409_v52 = vmul.f32 %v1995_v48, %v407_v51 }
 0x504   :  { %v412_v49 = vpop.permute.xlu0 %411 }
 0x505   :  { %v414_v50 = vmul.f32 %v1995_v48, %v412_v49 }
 0x507   :  { %416 = vrot.lane.b32.xlu1 %v414_v50, %s2132_s0 }
 0x579   :  { %v417_v53 = vpop.permute.xlu1 %416 }
 0x57a   :  { %v419_v54 = vadd.f32 %v417_v53, %v409_v52 }
 0x57c   :  { %1996 = vtanh.f32 %v419_v54  ;;  %v514_v10 = vrot.slane %v419_v54, 6 }
 0x586   :  { %v1997_v55 = vpop.eup %1996 }
 0x587   :  { %422 = vrot.lane.b32.xlu0 %v1997_v55, %s2132_s0 }
 0x5f9   :  { %v423_v56 = vpop.permute.xlu0 %422 }
 0x5fa   :  { %v425_v57 = vmul.f32 %v1995_v48, %v423_v56 }
 0x5fc   :  { %v427_v58 = vrot.slane %v425_v57, 2 }
 0x5fe   :  { %428 = vrot.lane.b32.xlu1 %v427_v58, %s2133_s1 }
 0x670   :  { %v429_v59 = vpop.permute.xlu1 %428 }
 0x671   :  { %1802 = vmatmul.mubr.msk.f32.vlgmr.msra.gmra.mrb[4].mxu0 %vm221_vm4, %v429_v59 }
 0x672   :  { %1928 = vmatpush3.bf16.msra.mxu0 %v2174_v6  ;;  %1823 = vmatprep.mubr.msk.f32.mxu0 %vm2130_vm2, %v2131_v13 }
 0x673   :  { %1929 = vmatprep.subr.bf16.mxu0 %v2129_v3 }
 0x676   :  { %1931 = vmatpush3.bf16.msra.mxu0 %v2178_v12 }
 0x677   :  { %1938 = vmatprep.subr.bf16.mxu0 %v2129_v3 }
 0x744   :  { %v498_v60 = vpop.f32.mrb[4].mxu0 }
 0x745   :  { %v503_v61 = vrot.slane %v498_v60, 4  ;;  %v1803_v62 = vpop.f32.mrb[5].mxu0 }
 0x747   :  { %v505_v63 = vadd.f32 %v503_v61, %v2202_v24 }
 0x749   :  { %1998 = vtanh.f32 %v505_v63  ;;  %v1670_v1 = vmul.f32 -1.442695, %v505_v63 }
 0x74b   :  { %2000 = vpow2.f32 %v1670_v1 }
 0x753   :  { %v1999_v0 = vpop.eup %1998 }
 0x754   :  { %518 = vrot.lane.b32.xlu0 %v1999_v0, %s2132_s0 }
 0x755   :  { %v2001_v4 = vpop.eup %2000 }
 0x756   :  { %v509_v5 = vadd.f32 1.0, %v2001_v4 }
 0x758   :  { %2002 = vrcp.f32 %v509_v5 }
 0x762   :  { %v2003_v7 = vpop.eup %2002 }
 0x763   :  { %v516_v11 = vmul.f32 %v2003_v7, %v514_v10 }
 0x7c6   :  { %v519_v8 = vpop.permute.xlu0 %518 }
 0x7c7   :  { %v521_v9 = vmul.f32 %v2003_v7, %v519_v8 }
 0x7c9   :  { %523 = vrot.lane.b32.xlu1 %v521_v9, %s2132_s0 }
 0x83b   :  { %v524_v14 = vpop.permute.xlu1 %523 }
 0x83c   :  { %v526_v15 = vadd.f32 %v524_v14, %v516_v11 }
 0x83e   :  { %2004 = vtanh.f32 %v526_v15  ;;  %v621_v34 = vrot.slane %v526_v15, 6 }
 0x848   :  { %v2005_v16 = vpop.eup %2004 }
 0x849   :  { %529 = vrot.lane.b32.xlu0 %v2005_v16, %s2132_s0 }
 0x8bb   :  { %v530_v17 = vpop.permute.xlu0 %529 }
 0x8bc   :  { %v532_v18 = vmul.f32 %v2003_v7, %v530_v17 }
 0x8be   :  { %v534_v19 = vrot.slane %v532_v18, 4 }
 0x8c0   :  { %535 = vrot.lane.b32.xlu1 %v534_v19, %s2133_s1 }
 0x932   :  { %v536_v20 = vpop.permute.xlu1 %535 }
 0x933   :  { %1813 = vmatmul.mubr.msk.f32.vlgmr.msra.gmra.mrb[4].mxu1 %vm221_vm4, %v536_v20 }
 0x934   :  { %1934 = vmatpush3.bf16.msra.mxu1 %v2174_v6  ;;  %1834 = vmatprep.mubr.msk.f32.mxu1 %vm2130_vm2, %v2131_v13 }
 0x935   :  { %1935 = vmatprep.subr.bf16.mxu1 %v2129_v3 }
 0x938   :  { %1937 = vmatpush3.bf16.msra.mxu1 %v2178_v12 }
 0x939   :  { %1944 = vmatprep.subr.bf16.mxu1 %v2129_v3 }
 0xa06   :  { %v605_v21 = vpop.f32.mrb[4].mxu1 }
 0xa07   :  { %v610_v23 = vrot.slane %v605_v21, 2  ;;  %v1814_v25 = vpop.f32.mrb[5].mxu1 }
 0xa09   :  { %v612_v26 = vadd.f32 %v610_v23, %v2202_v24 }
 0xa0b   :  { %2006 = vtanh.f32 %v612_v26  ;;  %v1672_v28 = vmul.f32 -1.442695, %v612_v26 }
 0xa0d   :  { %2008 = vpow2.f32 %v1672_v28 }
 0xa15   :  { %v2007_v27 = vpop.eup %2006 }
 0xa16   :  { %625 = vrot.lane.b32.xlu0 %v2007_v27, %s2132_s0 }
 0xa17   :  { %v2009_v29 = vpop.eup %2008 }
 0xa18   :  { %v616_v30 = vadd.f32 1.0, %v2009_v29 }
 0xa1a   :  { %2010 = vrcp.f32 %v616_v30 }
 0xa24   :  { %v2011_v31 = vpop.eup %2010 }
 0xa25   :  { %v623_v35 = vmul.f32 %v2011_v31, %v621_v34 }
 0xa88   :  { %v626_v32 = vpop.permute.xlu0 %625 }
 0xa89   :  { %v628_v33 = vmul.f32 %v2011_v31, %v626_v32 }
 0xa8b   :  { %630 = vrot.lane.b32.xlu1 %v628_v33, %s2132_s0 }
 0xafd   :  { %v631_v36 = vpop.permute.xlu1 %630 }
 0xafe   :  { %v633_v37 = vadd.f32 %v631_v36, %v623_v35 }
 0xb00   :  { %2012 = vtanh.f32 %v633_v37  ;;  %v725_v52 = vrot.slane %v633_v37, 6 }
 0xb0a   :  { %v2013_v24 = vpop.eup %2012 }
 0xb0b   :  { %636 = vrot.lane.b32.xlu0 %v2013_v24, %s2132_s0 }
 0xb7d   :  { %v637_v38 = vpop.permute.xlu0 %636 }
 0xb7e   :  { %v639_v39 = vmul.f32 %v2011_v31, %v637_v38 }
 0xb80   :  { %v641_v40 = vrot.slane %v639_v39, 6 }
 0xb82   :  { %642 = vrot.lane.b32.xlu1 %v641_v40, %s2133_s1 }
 0xbf4   :  { %v643_v41 = vpop.permute.xlu1 %642 }
 0xbf5   :  { %1824 = vmatmul.mubr.msk.f32.vlgmr.msra.gmra.mrb[6].mxu0 %vm221_vm4, %v643_v41 }
 0xbf6   :  { %1940 = vmatpush3.bf16.msra.mxu0 %v2174_v6  ;;  %1845 = vmatprep.mubr.msk.f32.mxu0 %vm2130_vm2, %v2131_v13 }
 0xbf7   :  { %1941 = vmatprep.subr.bf16.mxu0 %v2129_v3 }
 0xbfa   :  { %1943 = vmatpush3.bf16.msra.mxu0 %v2178_v12 }
 0xbfb   :  { %1950 = vmatprep.subr.bf16.mxu0 %v2129_v3 }
 0xcc8   :  { %v712_v42 = vpop.f32.mrb[6].mxu0 }
 0xcc9   :  { %v716_v43 = vadd.f32 %v712_v42, %v2200_v22  ;;  %v1825_v44 = vpop.f32.mrb[7].mxu0 }
 0xccb   :  { %2014 = vtanh.f32 %v716_v43  ;;  %v1674_v46 = vmul.f32 -1.442695, %v716_v43 }
 0xccd   :  { %2016 = vpow2.f32 %v1674_v46 }
 0xcd5   :  { %v2015_v45 = vpop.eup %2014 }
 0xcd6   :  { %729 = vrot.lane.b32.xlu0 %v2015_v45, %s2132_s0 }
 0xcd7   :  { %v2017_v47 = vpop.eup %2016 }
 0xcd8   :  { %v720_v48 = vadd.f32 1.0, %v2017_v47 }
 0xcda   :  { %2018 = vrcp.f32 %v720_v48 }
 0xce4   :  { %v2019_v49 = vpop.eup %2018 }
 0xce5   :  { %v727_v53 = vmul.f32 %v2019_v49, %v725_v52 }
 0xd48   :  { %v730_v50 = vpop.permute.xlu0 %729 }
 0xd49   :  { %v732_v51 = vmul.f32 %v2019_v49, %v730_v50 }
 0xd4b   :  { %734 = vrot.lane.b32.xlu1 %v732_v51, %s2132_s0  ;;  %v2134_v51 = vmov 3  }
 0xd4c   :  { %1979 = vset.pattern.permute.xlu1 %v2134_v51 }
 0xdbd   :  { %v735_v54 = vpop.permute.xlu1 %734 }
 0xdbe   :  { %v737_v55 = vadd.f32 %v735_v54, %v727_v53 }
 0xdc0   :  { %2020 = vtanh.f32 %v737_v55 }
 0xdca   :  { %v2021_v56 = vpop.eup %2020 }
 0xdcb   :  { %740 = vrot.lane.b32.xlu0 %v2021_v56, %s2132_s0  ;;  %v35_v56 = vld [vmem:[#allocation2 + $0x48] sm:$0xff] }
 0xe3d   :  { %v741_v57 = vpop.permute.xlu0 %740 }
 0xe3e   :  { %v743_v58 = vmul.f32 %v2019_v49, %v741_v57  ;;  %v36_v57 = vld [vmem:[#allocation2 + $0x50] sm:$0xff] }
 0xe40   :  { %745 = vrot.lane.b32.xlu1 %v743_v58, %s2133_s1  ;;  %v37_v58 = vld [vmem:[#allocation2 + $0x58] sm:$0xff] }
 0xeb2   :  { %v746_v59 = vpop.permute.xlu1 %745 }
 0xeb3   :  { %1835 = vmatmul.mubr.msk.f32.vlgmr.msra.gmra.mrb[6].mxu1 %vm221_vm4, %v746_v59 }
 0xeb4   :  { %1946 = vmatpush3.bf16.msra.mxu1 %v2174_v6  ;;  %1856 = vmatprep.mubr.msk.f32.mxu1 %vm2130_vm2, %v2131_v13 }
 0xeb5   :  { %1947 = vmatprep.subr.bf16.mxu1 %v2129_v3 }
 0xeb8   :  { %1949 = vmatpush3.bf16.msra.mxu1 %v2178_v12  ;;  %v831_v12 = vrot.slane %v737_v55, 6  ;;  %v34_v55 = vld [vmem:[#allocation2 + $0x40] sm:$0xff] }
 0xeb9   :  { %1956 = vmatprep.subr.bf16.mxu1 %v2129_v3  ;;  %v1951_v59 = vpack.c.bf16 %v35_v56, %v34_v55 }
 0xf86   :  { %v815_v60 = vpop.f32.mrb[6].mxu1 }
 0xf87   :  { %v820_v61 = vrot.slane %v815_v60, 6  ;;  %v1836_v62 = vpop.f32.mrb[7].mxu1  ;;  %v32_v60 = vld [vmem:[#allocation2 + $0x30] sm:$0xff] }
 0xf89   :  { %v822_v63 = vadd.f32 %v820_v61, %v2200_v22  ;;  %v33_v61 = vld [vmem:[#allocation2 + $0x38] sm:$0xff] }
 0xf8a   :  { %v2284_v62 = vpack.c.bf16 %v33_v61, %v32_v60 }
 0xf8b   :  { %2022 = vtanh.f32 %v822_v63  ;;  %v1676_v1 = vmul.f32 -1.442695, %v822_v63  ;;  %v1954_v63 = vpack.c.bf16 %v37_v58, %v36_v57 }
 0xf8d   :  { %2024 = vpow2.f32 %v1676_v1  ;;  %v2293_v1 = vld [vmem:[#allocation2 + $0x63] ss:$0 sm:$0xff] }
 0xf95   :  { %v2023_v0 = vpop.eup %2022 }
 0xf96   :  { %835 = vrot.lane.b32.xlu0 %v2023_v0, %s2132_s0  ;;  %v2291_v0 = vld [vmem:[#allocation2 + $0x62] ss:$0 sm:$0xff] }
 0xf97   :  { %v2025_v6 = vpop.eup %2024 }
 0xf98   :  { %v826_v4 = vadd.f32 1.0, %v2025_v6 }
 0xf9a   :  { %2026 = vrcp.f32 %v826_v4 }
 0xfa4   :  { %v2027_v5 = vpop.eup %2026 }
 0xfa5   :  { %v833_v9 = vmul.f32 %v2027_v5, %v831_v12 }
0x1008   :  { %v836_v7 = vpop.permute.xlu0 %835 }
0x1009   :  { %v838_v8 = vmul.f32 %v2027_v5, %v836_v7 }
0x100b   :  { %840 = vrot.lane.b32.xlu1 %v838_v8, %s2132_s0 }
0x107d   :  { %v841_v10 = vpop.permute.xlu1 %840 }
0x107e   :  { %v843_v11 = vadd.f32 %v841_v10, %v833_v9 }
0x1080   :  { %2028 = vtanh.f32 %v843_v11  ;;  %v938_v32 = vrot.slane %v843_v11, 6 }
0x108a   :  { %v2029_v14 = vpop.eup %2028 }
0x108b   :  { %846 = vrot.lane.b32.xlu0 %v2029_v14, %s2132_s0 }
0x10fd   :  { %v847_v15 = vpop.permute.xlu0 %846 }
0x10fe   :  { %v849_v16 = vmul.f32 %v2027_v5, %v847_v15 }
0x1100   :  { %v851_v17 = vrot.slane %v849_v16, 2  ;;  %v1681_v16 = vld [vmem:[#allocation2 + $0x61] ss:$0 sm:$0xff] }
0x1102   :  { %852 = vrot.lane.b32.xlu1 %v851_v17, %s2133_s1 }
0x1174   :  { %v853_v18 = vpop.permute.xlu1 %852 }
0x1175   :  { %1846 = vmatmul.mubr.msk.f32.vlgmr.msra.gmra.mrb[8].mxu0 %vm221_vm4, %v853_v18 }
0x1176   :  { %1867 = vmatprep.mubr.msk.f32.mxu0 %vm2130_vm2, %v2131_v13  ;;  %1952 = vmatpush3.bf16.msra.mxu0 %v1951_v59 }
0x1177   :  { %1953 = vmatprep.subr.bf16.mxu0 %v2129_v3 }
0x117a   :  { %1955 = vmatpush3.bf16.msra.mxu0 %v1954_v63 }
0x117b   :  { %1962 = vmatprep.subr.bf16.mxu0 %v2129_v3 }
0x1248   :  { %v922_v19 = vpop.f32.mrb[8].mxu0 }
0x1249   :  { %v927_v20 = vrot.slane %v922_v19, 4  ;;  %v1847_v21 = vpop.f32.mrb[9].mxu0 }
0x124b   :  { %v929_v23 = vadd.f32 %v927_v20, %v2200_v22 }
0x124d   :  { %2030 = vtanh.f32 %v929_v23  ;;  %v1678_v26 = vmul.f32 -1.442695, %v929_v23 }
0x124f   :  { %2032 = vpow2.f32 %v1678_v26 }
0x1257   :  { %v2031_v25 = vpop.eup %2030 }
0x1258   :  { %942 = vrot.lane.b32.xlu0 %v2031_v25, %s2132_s0 }
0x1259   :  { %v2033_v27 = vpop.eup %2032 }
0x125a   :  { %v933_v28 = vadd.f32 1.0, %v2033_v27 }
0x125c   :  { %2034 = vrcp.f32 %v933_v28 }
0x1266   :  { %v2035_v29 = vpop.eup %2034 }
0x1267   :  { %v940_v33 = vmul.f32 %v2035_v29, %v938_v32 }
0x12ca   :  { %v943_v30 = vpop.permute.xlu0 %942 }
0x12cb   :  { %v945_v31 = vmul.f32 %v2035_v29, %v943_v30 }
0x12cd   :  { %947 = vrot.lane.b32.xlu1 %v945_v31, %s2132_s0 }
0x133f   :  { %v948_v34 = vpop.permute.xlu1 %947 }
0x1340   :  { %v950_v35 = vadd.f32 %v948_v34, %v940_v33 }
0x1342   :  { %2036 = vtanh.f32 %v950_v35  ;;  %v1045_v52 = vrot.slane %v950_v35, 6 }
0x134c   :  { %v2037_v36 = vpop.eup %2036 }
0x134d   :  { %953 = vrot.lane.b32.xlu0 %v2037_v36, %s2132_s0 }
0x13bf   :  { %v954_v37 = vpop.permute.xlu0 %953 }
0x13c0   :  { %v956_v24 = vmul.f32 %v2035_v29, %v954_v37  ;;  %v1687_v29 = vld [vmem:[#allocation2 + $0x64] ss:$0 sm:$0xff] }
0x13c2   :  { %v958_v38 = vrot.slane %v956_v24, 4 }
0x13c4   :  { %959 = vrot.lane.b32.xlu1 %v958_v38, %s2133_s1 }
0x1436   :  { %v960_v39 = vpop.permute.xlu1 %959 }
0x1437   :  { %1857 = vmatmul.mubr.msk.f32.vlgmr.msra.gmra.mrb[8].mxu1 %vm221_vm4, %v960_v39 }
0x1438   :  { %1874 = vmatprep.mubr.msk.f32.mxu1 %vm2130_vm2, %v2131_v13  ;;  %1958 = vmatpush3.bf16.msra.mxu1 %v2284_v62 }
0x1439   :  { %1959 = vmatprep.subr.bf16.mxu1 %v2129_v3 }
0x150a   :  { %v1029_v40 = vpop.f32.mrb[8].mxu1 }
0x150b   :  { %v1034_v41 = vrot.slane %v1029_v40, 2  ;;  %v1858_v42 = vpop.f32.mrb[9].mxu1  ;;  %v2135_v40 = vmov 0  }
0x150c   :  { %1981 = vset.pattern.permute.xlu0 %v2135_v40 }
0x150d   :  { %v1036_v43 = vadd.f32 %v1034_v41, %v2200_v22  ;;  %v2322_v41 = vld [vmem:[#allocation2 + $0x65] ss:$0 sm:$0xff] }
0x150f   :  { %2038 = vtanh.f32 %v1036_v43  ;;  %v1680_v45 = vmul.f32 -1.442695, %v1036_v43 }
0x1511   :  { %2040 = vpow2.f32 %v1680_v45 }
0x1519   :  { %v2039_v44 = vpop.eup %2038 }
0x151a   :  { %1049 = vrot.lane.b32.xlu0 %v2039_v44, %s2132_s0 }
0x151b   :  { %v2041_v46 = vpop.eup %2040 }
0x151c   :  { %v1040_v47 = vadd.f32 1.0, %v2041_v46 }
0x151e   :  { %2042 = vrcp.f32 %v1040_v47 }
0x1528   :  { %v2043_v48 = vpop.eup %2042 }
0x1529   :  { %v1047_v22 = vmul.f32 %v2043_v48, %v1045_v52 }
0x158c   :  { %v1050_v49 = vpop.permute.xlu0 %1049 }
0x158d   :  { %v1052_v50 = vmul.f32 %v2043_v48, %v1050_v49 }
0x158f   :  { %1054 = vrot.lane.b32.xlu1 %v1052_v50, %s2132_s0 }
0x1593   :  { %1147 = vperm.xlu1 %1979, %v2170_v2  }
0x1597   :  { %1980 = vset.pattern.permute.xlu1 %v2135_v40 }
0x1601   :  { %v1055_v53 = vpop.permute.xlu1 %1054 }
0x1602   :  { %v1057_v54 = vadd.f32 %v1055_v53, %v1047_v22 }
0x1604   :  { %2044 = vtanh.f32 %v1057_v54  ;;  %v2313_v30 = vrot.slane %v1057_v54, 6 }
0x160e   :  { %v2045_v2 = vpop.eup %2044 }
0x160f   :  { %1060 = vrot.lane.b32.xlu0 %v2045_v2, %s2132_s0 }
0x1612   :  { %v1148_v6 = vpop.permute.xlu1 %1147 }
0x1613   :  { %v1154_v4 = vmul.f32 %v2291_v0, %v1148_v6 }
0x1615   :  { %v1159_v5 = vadd.f32 %v2293_v1, %v1154_v4 }
0x1617   :  { %v1160_v7 = vmax.f32 %v1159_v5, 0.0 }
0x1619   :  { %v1162_v8 = vrot.slane %v1160_v7, 6 }
0x161b   :  { %1875 = vmatmul.mubr.msk.f32.vlgmr.msra.gmra.mrb[10].mxu1 %vm139_vm3, %v1162_v8 }
0x161c   :  { %1961 = vmatpush3.bf16.msra.mxu1 %v2284_v62  ;;  %1881 = vmatprep.mubr.msk.f32.mxu1 %vm2130_vm2, %v2131_v13 }
0x161d   :  { %1965 = vmatprep.subr.bf16.mxu1 %v2129_v3 }
0x1681   :  { %v1061_v12 = vpop.permute.xlu0 %1060 }
0x1682   :  { %v1063_v9 = vmul.f32 %v2043_v48, %v1061_v12 }
0x1684   :  { %v1069_v10 = vrot.slane %v1063_v9, 6 }
0x1686   :  { %1070 = vrot.lane.b32.xlu0 %v1069_v10, %s2133_s1 }
0x16ee   :  { %v1231_v14 = vpop.f32.mrb[10].mxu1 }
0x16ef   :  { %v1876_v15 = vpop.f32.mrb[11].mxu1 }
0x16f8   :  { %v1071_v11 = vpop.permute.xlu0 %1070 }
0x16f9   :  { %1868 = vmatmul.mubr.msk.f32.vlgmr.msra.gmra.mrb[10].mxu0 %vm221_vm4, %v1071_v11 }
0x16fa   :  { %1964 = vmatpush3.bf16.msra.mxu0 %v2284_v62  ;;  %1888 = vmatprep.mubr.msk.f32.mxu0 %vm2130_vm2, %v2131_v13 }
0x17cc   :  { %v1140_v17 = vpop.f32.mrb[10].mxu0 }
0x17cd   :  { %v2307_v18 = vadd.f32 %v1681_v16, %v1140_v17  ;;  %v1869_v3 = vpop.f32.mrb[11].mxu0 }
0x17cf   :  { %v1235_v19 = vadd.f32 %v1231_v14, %v2307_v18 }
0x17d1   :  { %2046 = vtanh.f32 %v1235_v19  ;;  %v1686_v21 = vmul.f32 -1.442695, %v1235_v19 }
0x17d3   :  { %2048 = vpow2.f32 %v1686_v21 }
0x17db   :  { %v2047_v20 = vpop.eup %2046 }
0x17dc   :  { %1248 = vrot.lane.b32.xlu1 %v2047_v20, %s2132_s0 }
0x17dd   :  { %v2049_v23 = vpop.eup %2048 }
0x17de   :  { %v1239_v25 = vadd.f32 1.0, %v2049_v23 }
0x17e0   :  { %2050 = vrcp.f32 %v1239_v25 }
0x17ea   :  { %v2051_v26 = vpop.eup %2050 }
0x17eb   :  { %v1246_v31 = vmul.f32 %v2051_v26, %v2313_v30 }
0x184e   :  { %v1249_v27 = vpop.permute.xlu1 %1248 }
0x184f   :  { %v1251_v28 = vmul.f32 %v2051_v26, %v1249_v27 }
0x1851   :  { %1253 = vrot.lane.b32.xlu0 %v1251_v28, %s2132_s0 }
0x1855   :  { %1268 = vrot.lane.b32.xlu0 %v1687_v29, %s2133_s1 }
0x18c3   :  { %v1254_v32 = vpop.permute.xlu0 %1253 }
0x18c4   :  { %v1256_v33 = vadd.f32 %v1254_v32, %v1246_v31 }
0x18c6   :  { %2052 = vtanh.f32 %v1256_v33 }
0x18c7   :  { %v2317_v36 = vpop.permute.xlu0 %1268 }
0x18d0   :  { %v2053_v34 = vpop.eup %2052 }
0x18d1   :  { %1259 = vrot.lane.b32.xlu1 %v2053_v34, %s2132_s0 }
0x1943   :  { %v1260_v35 = vpop.permute.xlu1 %1259 }
0x1944   :  { %v1262_v37 = vmul.f32 %v2051_v26, %v1260_v35 }
0x1946   :  { %v1271_v24 = vmul.f32 %v2317_v36, %v1262_v37 }
0x1948   :  { %1273 = vrot.lane.b32.xlu1 %v1271_v24, %s2133_s1 }
0x19ba   :  { %v1274_v38 = vpop.permute.xlu1 %1273 }
0x19bb   :  { %v1277_v39 = vsel %vm1276_vm5, %v1274_v38, 0.0 }
0x19bc   :  { %1278 = vadd.xlane.f32.xlu0 %v1277_v39 }
0x1a49   :  { %v1279_v42 = vpop.xlane.xlu0 %1278 }
0x1a4a   :  { %v1284_v43 = vadd.f32 %v2322_v41, %v1279_v42 }
0x1a4c   :  { %1288 = vperm.xlu1 %1980, %v1284_v43  }
0x1acb   :  { %v2325_v44 = vpop.permute.xlu1 %1288 }
0x1acc   :  { %v1292_v45 = vmul.f32 %v2291_v0, %v2325_v44 }
0x1ace   :  { %v1293_v46 = vadd.f32 %v2293_v1, %v1292_v45 }
0x1ad0   :  { %v1294_v47 = vmax.f32 %v1293_v46, 0.0 }
0x1ad2   :  { %1882 = vmatmul.mubr.msk.f32.vlgmr.msra.gmra.mrb[12].mxu1 %vm139_vm3, %v1294_v47 }
0x1ad3   :  { %1967 = vmatpush3.bf16.msra.mxu1 %v2284_v62  ;;  %1895 = vmatprep.mubr.msk.f32.mxu1 %vm2130_vm2, %v2131_v13 }
0x1ba5   :  { %v1364_v48 = vpop.f32.mrb[12].mxu1 }
0x1ba6   :  { %v1368_v49 = vadd.f32 %v1364_v48, %v2307_v18  ;;  %v1883_v50 = vpop.f32.mrb[13].mxu1 }
0x1ba8   :  { %2054 = vtanh.f32 %v1368_v49  ;;  %v1690_v52 = vmul.f32 -1.442695, %v1368_v49 }
0x1baa   :  { %2056 = vpow2.f32 %v1690_v52 }
0x1bb2   :  { %v2055_v51 = vpop.eup %2054 }
0x1bb3   :  { %1378 = vrot.lane.b32.xlu1 %v2055_v51, %s2132_s0 }
0x1bb4   :  { %v2057_v22 = vpop.eup %2056 }
0x1bb5   :  { %v1372_v53 = vadd.f32 1.0, %v2057_v22 }
0x1bb7   :  { %2058 = vrcp.f32 %v1372_v53 }
0x1bc1   :  { %v2059_v54 = vpop.eup %2058 }
0x1bc2   :  { %v1376_v13 = vmul.f32 %v2059_v54, %v2313_v30 }
0x1c25   :  { %v1379_v55 = vpop.permute.xlu1 %1378 }
0x1c26   :  { %v1381_v56 = vmul.f32 %v2059_v54, %v1379_v55 }
0x1c28   :  { %1383 = vrot.lane.b32.xlu1 %v1381_v56, %s2132_s0 }
0x1c9a   :  { %v1384_v57 = vpop.permute.xlu1 %1383 }
0x1c9b   :  { %v1386_v58 = vadd.f32 %v1384_v57, %v1376_v13 }
0x1c9d   :  { %2060 = vtanh.f32 %v1386_v58 }
0x1ca7   :  { %v2061_v59 = vpop.eup %2060 }
0x1ca8   :  { %1389 = vrot.lane.b32.xlu1 %v2061_v59, %s2132_s0 }
0x1d1a   :  { %v1390_v60 = vpop.permute.xlu1 %1389 }
0x1d1b   :  { %v1392_v61 = vmul.f32 %v2059_v54, %v1390_v60 }
0x1d1d   :  { %v1393_v62 = vmul.f32 %v1392_v61, %v2317_v36 }
0x1d1f   :  { %1395 = vrot.lane.b32.xlu1 %v1393_v62, %s2133_s1 }
0x1d91   :  { %v1396_v63 = vpop.permute.xlu1 %1395 }
0x1d92   :  { %v1398_v2 = vsel %vm1276_vm5, %v1396_v63, 0.0 }
0x1d93   :  { %1399 = vadd.xlane.f32.xlu1 %v1398_v2 }
0x1e20   :  { %v1400_v6 = vpop.xlane.xlu1 %1399 }
0x1e21   :  { %v1401_v4 = vadd.f32 %v2322_v41, %v1400_v6 }
0x1e23   :  { %1405 = vperm.xlu0 %1981, %v1401_v4  }
0x1ea2   :  { %v2343_v5 = vpop.permute.xlu0 %1405 }
0x1ea3   :  { %v1409_v7 = vmul.f32 %v2291_v0, %v2343_v5 }
0x1ea5   :  { %v1410_v8 = vadd.f32 %v2293_v1, %v1409_v7 }
0x1ea7   :  { %v1411_v12 = vmax.f32 %v1410_v8, 0.0 }
0x1ea9   :  { %1889 = vmatmul.mubr.msk.f32.vlgmr.msra.gmra.mrb[12].mxu0 %vm139_vm3, %v1411_v12 }
0x1f7c   :  { %v1481_v9 = vpop.f32.mrb[12].mxu0 }
0x1f7d   :  { %v1485_v10 = vadd.f32 %v1481_v9, %v2307_v18  ;;  %v1890_v11 = vpop.f32.mrb[13].mxu0 }
0x1f7f   :  { %2062 = vtanh.f32 %v1485_v10  ;;  %v1692_v15 = vmul.f32 -1.442695, %v1485_v10 }
0x1f81   :  { %2064 = vpow2.f32 %v1692_v15 }
0x1f89   :  { %v2063_v14 = vpop.eup %2062 }
0x1f8a   :  { %1495 = vrot.lane.b32.xlu1 %v2063_v14, %s2132_s0 }
0x1f8b   :  { %v2065_v16 = vpop.eup %2064 }
0x1f8c   :  { %v1489_v17 = vadd.f32 1.0, %v2065_v16 }
0x1f8e   :  { %2066 = vrcp.f32 %v1489_v17 }
0x1f98   :  { %v2067_v3 = vpop.eup %2066 }
0x1f99   :  { %v1493_v21 = vmul.f32 %v2067_v3, %v2313_v30 }
0x1ffc   :  { %v1496_v19 = vpop.permute.xlu1 %1495 }
0x1ffd   :  { %v1498_v20 = vmul.f32 %v2067_v3, %v1496_v19 }
0x1fff   :  { %1500 = vrot.lane.b32.xlu1 %v1498_v20, %s2132_s0 }
0x2071   :  { %v1501_v23 = vpop.permute.xlu1 %1500 }
0x2072   :  { %v1503_v25 = vadd.f32 %v1501_v23, %v1493_v21 }
0x2074   :  { %2068 = vtanh.f32 %v1503_v25 }
0x207e   :  { %v2069_v26 = vpop.eup %2068 }
0x207f   :  { %1506 = vrot.lane.b32.xlu0 %v2069_v26, %s2132_s0 }
0x20f1   :  { %v1507_v27 = vpop.permute.xlu0 %1506 }
0x20f2   :  { %v1509_v28 = vmul.f32 %v2067_v3, %v1507_v27 }
0x20f4   :  { %v1510_v29 = vmul.f32 %v1509_v28, %v2317_v36 }
0x20f6   :  { %1512 = vrot.lane.b32.xlu1 %v1510_v29, %s2133_s1 }
0x2168   :  { %v1513_v31 = vpop.permute.xlu1 %1512 }
0x2169   :  { %v1515_v32 = vsel %vm1276_vm5, %v1513_v31, 0.0 }
0x216a   :  { %1516 = vadd.xlane.f32.xlu0 %v1515_v32 }
0x21f7   :  { %v1517_v33 = vpop.xlane.xlu0 %1516 }
0x21f8   :  { %v1518_v34 = vadd.f32 %v2322_v41, %v1517_v33 }
0x21fa   :  { %1522 = vperm.xlu1 %1980, %v1518_v34  }
0x2279   :  { %v1523_v35 = vpop.permute.xlu1 %1522 }
0x227a   :  { %v1526_v37 = vmul.f32 %v2291_v0, %v1523_v35 }
0x227c   :  { %v1527_v24 = vadd.f32 %v2293_v1, %v1526_v37 }
0x227e   :  { %v1528_v38 = vmax.f32 %v1527_v24, 0.0 }
0x2280   :  { %1896 = vmatmul.mubr.msk.f32.vlgmr.msra.gmra.mrb[14].mxu1 %vm139_vm3, %v1528_v38 }
0x2353   :  { %v1598_v39 = vpop.f32.mrb[14].mxu1 }
0x2354   :  { %v1602_v40 = vadd.f32 %v1598_v39, %v2307_v18  ;;  %v1897_v42 = vpop.f32.mrb[15].mxu1 }
0x2356   :  { %2070 = vtanh.f32 %v1602_v40  ;;  %v1694_v45 = vmul.f32 -1.442695, %v1602_v40 }
0x2358   :  { %2072 = vpow2.f32 %v1694_v45 }
0x2360   :  { %v2071_v43 = vpop.eup %2070 }
0x2361   :  { %1612 = vrot.lane.b32.xlu1 %v2071_v43, %s2132_s0 }
0x2362   :  { %v2073_v46 = vpop.eup %2072 }
0x2363   :  { %v1606_v47 = vadd.f32 1.0, %v2073_v46 }
0x2365   :  { %2074 = vrcp.f32 %v1606_v47 }
0x236f   :  { %v2075_v48 = vpop.eup %2074 }
0x2370   :  { %v1610_v1 = vmul.f32 %v2075_v48, %v2313_v30  ;;  %v1144_v30 = vlaneseq }
0x2372   :  { %v1145_v57 = vand.u32 127, %v1144_v30 }
0x2374   :  { %vm1285_vm6 = vcmp.eq.s32.totalorder %v1145_v57, 0  ;;  %vm1402_vm7 = vcmp.eq.s32.totalorder %v1145_v57, 1  ;;  %vm1519_vm8 = vcmp.eq.s32.totalorder %v1145_v57, 2  ;;  %vm1636_vm9 = vcmp.eq.s32.totalorder %v1145_v57, 3 }
0x2375   :  { %v1291_v58 = vsel %vm1285_vm6, %v2325_v44, 0.0 }
0x23d3   :  { %v1613_v0 = vpop.permute.xlu1 %1612 }
0x23d4   :  { %v1615_v49 = vmul.f32 %v2075_v48, %v1613_v0 }
0x23d6   :  { %1617 = vrot.lane.b32.xlu1 %v1615_v49, %s2132_s0 }
0x2448   :  { %v1618_v50 = vpop.permute.xlu1 %1617 }
0x2449   :  { %v1620_v51 = vadd.f32 %v1618_v50, %v1610_v1 }
0x244b   :  { %2076 = vtanh.f32 %v1620_v51 }
0x2455   :  { %v2077_v18 = vpop.eup %2076 }
0x2456   :  { %1623 = vrot.lane.b32.xlu1 %v2077_v18, %s2132_s0 }
0x24c8   :  { %v1624_v52 = vpop.permute.xlu1 %1623 }
0x24c9   :  { %v1626_v22 = vmul.f32 %v2075_v48, %v1624_v52 }
0x24cb   :  { %v1627_v53 = vmul.f32 %v1626_v22, %v2317_v36  ;;  %v1408_v36 = vsel %vm1402_vm7, %v2343_v5, %v1291_v58 }
0x24cc   :  { %v1525_v59 = vsel %vm1519_vm8, %v1523_v35, %v1408_v36 }
0x24cd   :  { %1629 = vrot.lane.b32.xlu1 %v1627_v53, %s2133_s1 }
0x253f   :  { %v1630_v54 = vpop.permute.xlu1 %1629 }
0x2540   :  { %v1632_v55 = vsel %vm1276_vm5, %v1630_v54, 0.0 }
0x2541   :  { %1633 = vadd.xlane.f32.xlu1 %v1632_v55 }
0x25ce   :  { %v1634_v56 = vpop.xlane.xlu1 %1633 }
0x25cf   :  { %v1635_v13 = vadd.f32 %v2322_v41, %v1634_v56 }
0x25d1   :  { %1639 = vperm.xlu0 %1981, %v1635_v13  }
0x2650   :  { %v1640_v60 = vpop.permute.xlu0 %1639 }
0x2651   :  { %v1642_v61 = vsel %vm1636_vm9, %v1640_v60, %v1525_v59 }
0x2652   :  { %1644 = vst.msk [vmem:[#allocation5] sm:$0x3] %vm1643_vm10, %v1642_v61 }
0x2653   :  { %2111 = shalt.err (!%p2108_p12)
}
0x2654   :  { %s2112_s4 = scalar_lea.hbm %s2386_s2, 32 }
0x2655   :  { %p2113_p13 = scmp.ne.s32.totalorder %s2386_s2, %s2112_s4  ;;  %p2116_p0 = scmp.lt.u32.totalorder %s2112_s4, %s2386_s2 }
0x2657   :  { %p2118_p1 = pnand %p2116_p0, %p2113_p13 }
0x2659   :  { %2121 = shalt.err (!%p2118_p1)
}
0x265a   :  { %1654 = dma.vmem_to_hbm [thread:$0]  %s1652_s28, 32, %s2386_s2, [#allocation4]  }
0x265b   :  { %2124 = dma.done.wait [#allocation4], 32  }
0x265c   :  { %2125 = vsyncadd [#allocation4], 4294967264 }
0x265d   :  { %1658 = vsyncpa [#allocation3], 1 }
0x265e   :  { %1659 = vsyncpa [#allocation4], 1 }

</bundles_post_ra>
